<compile_context>
chip_gen: v7x
topology: tpu7x:2x2x1
jax: 0.10.0
libtpu: 0.0.40
codegen_flags: <defaults>
</compile_context>

<pallas_src>
import math
import jax
import jax.numpy as jnp
from jax import lax
from jax.experimental import pallas as pl
from jax.experimental.pallas import tpu as pltpu


_HALO_DTYPE = jnp.bfloat16   # v6e/v7x: native bf16 VPU.  Use jnp.float32 on v5e.
_OUT_DTYPE = jnp.bfloat16    # attention consumes q/k/v in bf16.


def _fused_qkv_sepconv_kernel(x_ref, dw_ref, dwb_ref, pw_ref, pwb_ref,
                              out_ref, xp_ref):
    """One grid step = Bt batch elements, all three (q, k, v) branches fused.

    x_ref   : (Bt, H, W, C)   f32   input tile (NHWC)
    dw_ref  : (9, 3C)         f32   depthwise weights, row = di*3 + dj, cols = [q|k|v]
    dwb_ref : (1, 3C)         f32   depthwise bias, cols = [q|k|v]
    pw_ref  : (3C, Dp)        bf16  block-diagonal pointwise weights (zero padded)
    pwb_ref : (1, Dp)         f32   pointwise bias (zero padded)
    out_ref : (Bt, H*W, Dp)   bf16  lane-dense output, cols = [q | k | v | pad]
    xp_ref  : (Bt, H+2, W+2, 3C)    VMEM halo scratch (zero border)
    """
    Bt, H, W, _ = x_ref.shape
    C3 = dw_ref.shape[1]
    Dp = pw_ref.shape[1]

    # Zero only the thin halo border (cheap; correct under any grid->core
    # sharding since scratch is per-TensorCore and interior writes never touch
    # the border).
    zrow = jnp.zeros((Bt, 1, W + 2, C3), dtype=xp_ref.dtype)
    xp_ref[:, pl.ds(0, 1), :, :] = zrow
    xp_ref[:, pl.ds(H + 1, 1), :, :] = zrow
    zcol = jnp.zeros((Bt, H, 1, C3), dtype=xp_ref.dtype)
    xp_ref[:, pl.ds(1, H), pl.ds(0, 1), :] = zcol
    xp_ref[:, pl.ds(1, H), pl.ds(W + 1, 1), :] = zcol

    # Channel-triplicated interior ([q|k|v] share the activation) so a single
    # 9-tap loop serves all three branches.
    xv = x_ref[...]
    xp_ref[:, pl.ds(1, H), pl.ds(1, W), :] = (
        jnp.concatenate([xv, xv, xv], axis=-1).astype(xp_ref.dtype))
    xp = xp_ref[...]                                      # (Bt, H+2, W+2, 3C)

    # Hoist the sublane (column) shifts: 3 shifted panes instead of 9 slices.
    panes = [xp[:, :, dj:dj + W, :] for dj in range(3)]   # (Bt, H+2, W, 3C)

    # Depthwise 3x3 + bias (before ReLU, matching nn.Conv2d); f32 accumulation.
    dw = dw_ref[...]                                      # (9, 3C) f32
    acc = jnp.broadcast_to(dwb_ref[0], (Bt, H, W, C3))    # f32
    for di in range(3):
        for dj in range(3):
            acc = acc + panes[dj][:, di:di + H, :, :] * dw[di * 3 + dj]
    acc = jnp.maximum(acc, 0.0)

    # Pointwise 1x1 conv for all three branches == ONE MXU matmul against the
    # block-diagonal weight (bf16 operands, f32 accumulation).
    y = acc.reshape(Bt * H * W, C3).astype(jnp.bfloat16)
    out = jnp.dot(y, pw_ref[...], preferred_element_type=jnp.float32) + pwb_ref[0]
    out_ref[...] = out.reshape(Bt, H * W, Dp).astype(out_ref.dtype)


def prepare_conv_projection_params(params):
    """Fold per-branch SepConv2d params into fused kernel operands.  Call ONCE
    at parameter-init time (not inside the per-step traced forward)."""
    c = params["q"]["dw"].shape[1]
    D = params["q"]["pw"].shape[1]                 # inner_dim = heads * dim_head
    C3 = 3 * c
    Dp = max(128, -(-3 * D // 128) * 128)          # 3*inner_dim padded to lane width

    # [q | k | v] channel-concatenated depthwise weights / biases.
    dw_all = jnp.concatenate([params[t]["dw"] for t in ("q", "k", "v")], axis=-1)    # (9, 3C)
    dwb_all = jnp.concatenate([params[t]["dwb"] for t in ("q", "k", "v")], axis=-1)  # (1, 3C)

    # Block-diagonal pointwise weights, zero-padded to Dp columns, bf16 for MXU.
    pw_bd = jnp.zeros((C3, Dp), jnp.float32)
    pwb_all = jnp.zeros((1, Dp), jnp.float32)
    for i, t in enumerate(("q", "k", "v")):
        pw_bd = pw_bd.at[i * c:(i + 1) * c, i * D:(i + 1) * D].set(params[t]["pw"])
        pwb_all = pwb_all.at[:, i * D:(i + 1) * D].set(params[t]["pwb"])
    return {"dw": dw_all, "dwb": dwb_all,
            "pw": pw_bd.astype(jnp.bfloat16), "pwb": pwb_all}


def conv_projection(x, fused, heads, inner_dim):
    """x: (b, n, c)  ->  q, k, v each (b, heads, n, dim_head).

    `fused` must be prepare_conv_projection_params(raw_params) (built once).
    """
    # TODO(synk): cross-attention path (attn_kv != None) not wired up; the
    # module default attn_kv=None (k/v from x) is what is implemented here.
    b, n, c = x.shape
    l = int(math.sqrt(n))
    assert l * l == n, "n must be a perfect square"
    H = W = l
    x_img = x.reshape(b, H, W, c)     # NHWC view of the module's NCHW tensor

    D = inner_dim
    C3 = 3 * c
    Dp = fused["pw"].shape[1]

    # Batch-block: Bt images per grid step so the MXU matmul gets
    # M = Bt*H*W (target >= 256) and the fixed per-step cost is amortized.
    Bt = min(b, max(1, -(-256 // n)))
    while b % Bt:                      # keep the grid exact (no partial blocks)
        Bt -= 1
    grid = (b // Bt,)

    flops = 2 * b * n * C3 * Dp + 2 * 9 * b * n * C3
    bytes_accessed = (x_img.size * x_img.dtype.itemsize
                      + b * n * Dp * jnp.dtype(_OUT_DTYPE).itemsize
                      + fused["dw"].size * 4 + fused["dwb"].size * 4
                      + fused["pw"].size * 2 + fused["pwb"].size * 4)

    out = pl.pallas_call(
        _fused_qkv_sepconv_kernel,
        out_shape=jax.ShapeDtypeStruct((b, n, Dp), _OUT_DTYPE),
        grid=grid,
        in_specs=[
            pl.BlockSpec((Bt, H, W, c), lambda i: (i, 0, 0, 0)),
            pl.BlockSpec((9, C3), lambda i: (0, 0)),
            pl.BlockSpec((1, C3), lambda i: (0, 0)),
            pl.BlockSpec((C3, Dp), lambda i: (0, 0)),
            pl.BlockSpec((1, Dp), lambda i: (0, 0)),
        ],
        out_specs=pl.BlockSpec((Bt, n, Dp), lambda i: (i, 0, 0)),
        scratch_shapes=[pltpu.VMEM((Bt, H + 2, W + 2, C3), _HALO_DTYPE)],
        compiler_params=pltpu.CompilerParams(dimension_semantics=("parallel",)),
        cost_estimate=pl.CostEstimate(flops=flops, transcendentals=0,
                                      bytes_accessed=bytes_accessed),
    )(x_img, fused["dw"], fused["dwb"], fused["pw"], fused["pwb"])

    d_head = D // heads

    # NOTE(perf): a production pipeline should keep q/k/v as lane-contiguous
    # (b, n, D) column slices of `out` and fold 'b n (h d) -> b h n d' into the
    # consumer attention kernel's BlockSpec index_map; the transposes below are
    # kept only to return the module's documented output layout.
    def split_heads(sl):
        # 'b (l w) (h d) -> b h (l w) d'  (channel-major split == (h d) in NCHW)
        return sl.reshape(b, n, heads, d_head).transpose(0, 2, 1, 3)

    q = split_heads(out[:, :, 0 * D:1 * D])
    k = split_heads(out[:, :, 1 * D:2 * D])
    v = split_heads(out[:, :, 2 * D:3 * D])
    return q, k, v


def _make_sepconv_params(key, c, inner_dim):
    k1, k2, k3, k4 = jax.random.split(key, 4)
    return {
        "dw": 0.1 * jax.random.normal(k1, (9, c), jnp.float32),          # (kh*kw, C)
        "dwb": 0.1 * jax.random.normal(k2, (1, c), jnp.float32),
        "pw": 0.1 * jax.random.normal(k3, (c, inner_dim), jnp.float32),  # (C, D)
        "pwb": 0.1 * jax.random.normal(k4, (1, inner_dim), jnp.float32),
    }


def _sepconv_reference(x_img, p):
    """Pure-JAX reference (lax conv) for validation."""
    C = x_img.shape[-1]
    dw = p["dw"].reshape(3, 3, C)[:, :, None, :]          # (kh, kw, 1, C)
    y = lax.conv_general_dilated(
        x_img, dw, window_strides=(1, 1), padding=((1, 1), (1, 1)),
        dimension_numbers=("NHWC", "HWIO", "NHWC"), feature_group_count=C)
    y = jax.nn.relu(y + p["dwb"][0])
    return jnp.einsum("bhwc,cd->bhwd", y, p["pw"]) + p["pwb"][0]


if __name__ == "__main__":
    # Small shapes consistent with the module's forward:
    #   dim (=c) = 32, heads = 2, dim_head = 16 -> inner_dim = 32
    #   n = 64 (l = w = 8), batch = 2
    b, n, dim = 2, 64, 32
    heads, dim_head = 2, 16
    inner_dim = heads * dim_head

    key = jax.random.PRNGKey(0)
    kx, kq, kk, kv = jax.random.split(key, 4)
    x = jax.random.normal(kx, (b, n, dim), jnp.float32)
    params = {
        "q": _make_sepconv_params(kq, dim, inner_dim),
        "k": _make_sepconv_params(kk, dim, inner_dim),
        "v": _make_sepconv_params(kv, dim, inner_dim),
    }

    # Fused weights built once (outside the jitted step).
    fused = prepare_conv_projection_params(params)

    fwd = jax.jit(conv_projection, static_argnums=(2, 3))
    q, k, v = fwd(x, fused, heads, inner_dim)
    jax.block_until_ready((q, k, v))

    # Sanity check against a pure-JAX reference of the same math.
    l = int(math.sqrt(n))
    x_img = x.reshape(b, l, l, dim)
    for out, p in ((q, params["q"]), (k, params["k"]), (v, params["v"])):
        ref = _sepconv_reference(x_img, p)
        ref = ref.reshape(b, n, heads, dim_head).transpose(0, 2, 1, 3)
        assert out.shape == (b, heads, n, dim_head)
        # bf16 halo / bf16 MXU operands / bf16 output -> relaxed tolerance.
        err = float(jnp.max(jnp.abs(out.astype(jnp.float32) - ref)))
        assert jnp.allclose(out.astype(jnp.float32), ref, atol=3e-2, rtol=3e-2), err

    print("KERNEL_OK")
</pallas_src>

<mosaic_0001>
module attributes {stable_mosaic.version = 11 : i64} {
  func.func @_fused_qkv_sepconv_kernel(%arg0: i32, %arg1: memref<2x8x8x32xf32, #tpu.memory_space<vmem>>, %arg2: memref<9x96xf32, #tpu.memory_space<vmem>>, %arg3: memref<1x96xf32, #tpu.memory_space<vmem>>, %arg4: memref<96x128xbf16, #tpu.memory_space<vmem>>, %arg5: memref<1x128xf32, #tpu.memory_space<vmem>>, %arg6: memref<2x64x128xbf16, #tpu.memory_space<vmem>>, %arg7: memref<2x10x10x96xbf16, #tpu.memory_space<vmem>>) attributes {dimension_semantics = [#tpu.dimension_semantics<parallel>], iteration_bounds = array<i64: 1>, scalar_prefetch = 0 : i64, scratch_operands = 1 : i64, tpu.core_type = #tpu.core_type<tc>, window_params = [{transform_indices = @transform_0, window_bounds = array<i64: 2, 8, 8, 32>}, {pipeline_mode = #tpu.pipeline_mode<synchronous>, transform_indices = @transform_1, window_bounds = array<i64: 9, 96>}, {pipeline_mode = #tpu.pipeline_mode<synchronous>, transform_indices = @transform_2, window_bounds = array<i64: 1, 96>}, {pipeline_mode = #tpu.pipeline_mode<synchronous>, transform_indices = @transform_3, window_bounds = array<i64: 96, 128>}, {pipeline_mode = #tpu.pipeline_mode<synchronous>, transform_indices = @transform_4, window_bounds = array<i64: 1, 128>}, {transform_indices = @transform_5, window_bounds = array<i64: 2, 64, 128>}]} {
    %cst = arith.constant 0.000000e+00 : bf16
    %0 = vector.broadcast %cst : bf16 to vector<2x1x10x96xbf16>
    %c0 = arith.constant 0 : index
    %c0_0 = arith.constant 0 : index
    %c0_1 = arith.constant 0 : index
    %c0_2 = arith.constant 0 : index
    %1 = vector.load %arg7[%c0, %c0_0, %c0_1, %c0_2] : memref<2x10x10x96xbf16, #tpu.memory_space<vmem>>, vector<2x1x10x96xbf16>
    tpu.vector_store %arg7[%c0, %c0_0, %c0_1, %c0_2], %0 {strides = array<i32>} : memref<2x10x10x96xbf16, #tpu.memory_space<vmem>>, vector<2x1x10x96xbf16>,
    %c0_3 = arith.constant 0 : index
    %c9 = arith.constant 9 : index
    %c0_4 = arith.constant 0 : index
    %c0_5 = arith.constant 0 : index
    %2 = vector.load %arg7[%c0_3, %c9, %c0_4, %c0_5] : memref<2x10x10x96xbf16, #tpu.memory_space<vmem>>, vector<2x1x10x96xbf16>
    tpu.vector_store %arg7[%c0_3, %c9, %c0_4, %c0_5], %0 {strides = array<i32>} : memref<2x10x10x96xbf16, #tpu.memory_space<vmem>>, vector<2x1x10x96xbf16>,
    %cst_6 = arith.constant 0.000000e+00 : bf16
    %3 = vector.broadcast %cst_6 : bf16 to vector<2x8x1x96xbf16>
    %c0_7 = arith.constant 0 : index
    %c1 = arith.constant 1 : index
    %c0_8 = arith.constant 0 : index
    %c0_9 = arith.constant 0 : index
    %4 = vector.load %arg7[%c0_7, %c1, %c0_8, %c0_9] : memref<2x10x10x96xbf16, #tpu.memory_space<vmem>>, vector<2x8x1x96xbf16>
    tpu.vector_store %arg7[%c0_7, %c1, %c0_8, %c0_9], %3 {strides = array<i32>} : memref<2x10x10x96xbf16, #tpu.memory_space<vmem>>, vector<2x8x1x96xbf16>,
    %c0_10 = arith.constant 0 : index
    %c1_11 = arith.constant 1 : index
    %c9_12 = arith.constant 9 : index
    %c0_13 = arith.constant 0 : index
    %5 = vector.load %arg7[%c0_10, %c1_11, %c9_12, %c0_13] : memref<2x10x10x96xbf16, #tpu.memory_space<vmem>>, vector<2x8x1x96xbf16>
    tpu.vector_store %arg7[%c0_10, %c1_11, %c9_12, %c0_13], %3 {strides = array<i32>} : memref<2x10x10x96xbf16, #tpu.memory_space<vmem>>, vector<2x8x1x96xbf16>,
    %c0_14 = arith.constant 0 : index
    %c0_15 = arith.constant 0 : index
    %c0_16 = arith.constant 0 : index
    %c0_17 = arith.constant 0 : index
    %6 = vector.load %arg1[%c0_14, %c0_15, %c0_16, %c0_17] : memref<2x8x8x32xf32, #tpu.memory_space<vmem>>, vector<2x8x8x32xf32>
    %7 = tpu.concatenate %6, %6, %6 in 3 : vector<2x8x8x32xf32>, vector<2x8x8x32xf32>, vector<2x8x8x32xf32> -> vector<2x8x8x96xf32>
    %8 = arith.truncf %7 : vector<2x8x8x96xf32> to vector<2x8x8x96xbf16>
    %c0_18 = arith.constant 0 : index
    %c1_19 = arith.constant 1 : index
    %c1_20 = arith.constant 1 : index
    %c0_21 = arith.constant 0 : index
    %9 = vector.load %arg7[%c0_18, %c1_19, %c1_20, %c0_21] : memref<2x10x10x96xbf16, #tpu.memory_space<vmem>>, vector<2x8x8x96xbf16>
    tpu.vector_store %arg7[%c0_18, %c1_19, %c1_20, %c0_21], %8 {strides = array<i32>} : memref<2x10x10x96xbf16, #tpu.memory_space<vmem>>, vector<2x8x8x96xbf16>,
    %c0_22 = arith.constant 0 : index
    %c0_23 = arith.constant 0 : index
    %c0_24 = arith.constant 0 : index
    %c0_25 = arith.constant 0 : index
    %10 = vector.load %arg7[%c0_22, %c0_23, %c0_24, %c0_25] : memref<2x10x10x96xbf16, #tpu.memory_space<vmem>>, vector<2x10x10x96xbf16>
    %11 = vector.extract_strided_slice %10 {offsets = [0, 0, 0, 0], sizes = [2, 10, 8, 96], strides = [1, 1, 1, 1]} : vector<2x10x10x96xbf16> to vector<2x10x8x96xbf16>
    %12 = vector.extract_strided_slice %10 {offsets = [0, 0, 1, 0], sizes = [2, 10, 8, 96], strides = [1, 1, 1, 1]} : vector<2x10x10x96xbf16> to vector<2x10x8x96xbf16>
    %13 = vector.extract_strided_slice %10 {offsets = [0, 0, 2, 0], sizes = [2, 10, 8, 96], strides = [1, 1, 1, 1]} : vector<2x10x10x96xbf16> to vector<2x10x8x96xbf16>
    %c0_26 = arith.constant 0 : index
    %c0_27 = arith.constant 0 : index
    %14 = vector.load %arg2[%c0_26, %c0_27] : memref<9x96xf32, #tpu.memory_space<vmem>>, vector<9x96xf32>
    %c0_28 = arith.constant 0 : index
    %c0_29 = arith.constant 0 : index
    %15 = vector.load %arg3[%c0_28, %c0_29] : memref<1x96xf32, #tpu.memory_space<vmem>>, vector<1x96xf32>
    %16 = vector.shape_cast %15 : vector<1x96xf32> to vector<96xf32>
    %17 = vector.shape_cast %16 : vector<96xf32> to vector<1x1x1x96xf32>
    %18 = vector.broadcast %17 : vector<1x1x1x96xf32> to vector<2x8x8x96xf32>
    %19 = vector.extract_strided_slice %11 {offsets = [0, 0, 0, 0], sizes = [2, 8, 8, 96], strides = [1, 1, 1, 1]} : vector<2x10x8x96xbf16> to vector<2x8x8x96xbf16>
    %20 = vector.extract_strided_slice %14 {offsets = [0, 0], sizes = [1, 96], strides = [1, 1]} : vector<9x96xf32> to vector<1x96xf32>
    %21 = vector.shape_cast %20 : vector<1x96xf32> to vector<96xf32>
    %22 = arith.extf %19 : vector<2x8x8x96xbf16> to vector<2x8x8x96xf32>
    %23 = vector.shape_cast %21 : vector<96xf32> to vector<1x1x1x96xf32>
    %24 = vector.broadcast %23 : vector<1x1x1x96xf32> to vector<2x8x8x96xf32>
    %25 = arith.mulf %22, %24 : vector<2x8x8x96xf32>
    %26 = arith.addf %18, %25 : vector<2x8x8x96xf32>
    %27 = vector.extract_strided_slice %12 {offsets = [0, 0, 0, 0], sizes = [2, 8, 8, 96], strides = [1, 1, 1, 1]} : vector<2x10x8x96xbf16> to vector<2x8x8x96xbf16>
    %28 = vector.extract_strided_slice %14 {offsets = [1, 0], sizes = [1, 96], strides = [1, 1]} : vector<9x96xf32> to vector<1x96xf32>
    %29 = vector.shape_cast %28 : vector<1x96xf32> to vector<96xf32>
    %30 = arith.extf %27 : vector<2x8x8x96xbf16> to vector<2x8x8x96xf32>
    %31 = vector.shape_cast %29 : vector<96xf32> to vector<1x1x1x96xf32>
    %32 = vector.broadcast %31 : vector<1x1x1x96xf32> to vector<2x8x8x96xf32>
    %33 = arith.mulf %30, %32 : vector<2x8x8x96xf32>
    %34 = arith.addf %26, %33 : vector<2x8x8x96xf32>
    %35 = vector.extract_strided_slice %13 {offsets = [0, 0, 0, 0], sizes = [2, 8, 8, 96], strides = [1, 1, 1, 1]} : vector<2x10x8x96xbf16> to vector<2x8x8x96xbf16>
    %36 = vector.extract_strided_slice %14 {offsets = [2, 0], sizes = [1, 96], strides = [1, 1]} : vector<9x96xf32> to vector<1x96xf32>
    %37 = vector.shape_cast %36 : vector<1x96xf32> to vector<96xf32>
    %38 = arith.extf %35 : vector<2x8x8x96xbf16> to vector<2x8x8x96xf32>
    %39 = vector.shape_cast %37 : vector<96xf32> to vector<1x1x1x96xf32>
    %40 = vector.broadcast %39 : vector<1x1x1x96xf32> to vector<2x8x8x96xf32>
    %41 = arith.mulf %38, %40 : vector<2x8x8x96xf32>
    %42 = arith.addf %34, %41 : vector<2x8x8x96xf32>
    %43 = vector.extract_strided_slice %11 {offsets = [0, 1, 0, 0], sizes = [2, 8, 8, 96], strides = [1, 1, 1, 1]} : vector<2x10x8x96xbf16> to vector<2x8x8x96xbf16>
    %44 = vector.extract_strided_slice %14 {offsets = [3, 0], sizes = [1, 96], strides = [1, 1]} : vector<9x96xf32> to vector<1x96xf32>
    %45 = vector.shape_cast %44 : vector<1x96xf32> to vector<96xf32>
    %46 = arith.extf %43 : vector<2x8x8x96xbf16> to vector<2x8x8x96xf32>
    %47 = vector.shape_cast %45 : vector<96xf32> to vector<1x1x1x96xf32>
    %48 = vector.broadcast %47 : vector<1x1x1x96xf32> to vector<2x8x8x96xf32>
    %49 = arith.mulf %46, %48 : vector<2x8x8x96xf32>
    %50 = arith.addf %42, %49 : vector<2x8x8x96xf32>
    %51 = vector.extract_strided_slice %12 {offsets = [0, 1, 0, 0], sizes = [2, 8, 8, 96], strides = [1, 1, 1, 1]} : vector<2x10x8x96xbf16> to vector<2x8x8x96xbf16>
    %52 = vector.extract_strided_slice %14 {offsets = [4, 0], sizes = [1, 96], strides = [1, 1]} : vector<9x96xf32> to vector<1x96xf32>
    %53 = vector.shape_cast %52 : vector<1x96xf32> to vector<96xf32>
    %54 = arith.extf %51 : vector<2x8x8x96xbf16> to vector<2x8x8x96xf32>
    %55 = vector.shape_cast %53 : vector<96xf32> to vector<1x1x1x96xf32>
    %56 = vector.broadcast %55 : vector<1x1x1x96xf32> to vector<2x8x8x96xf32>
    %57 = arith.mulf %54, %56 : vector<2x8x8x96xf32>
    %58 = arith.addf %50, %57 : vector<2x8x8x96xf32>
    %59 = vector.extract_strided_slice %13 {offsets = [0, 1, 0, 0], sizes = [2, 8, 8, 96], strides = [1, 1, 1, 1]} : vector<2x10x8x96xbf16> to vector<2x8x8x96xbf16>
    %60 = vector.extract_strided_slice %14 {offsets = [5, 0], sizes = [1, 96], strides = [1, 1]} : vector<9x96xf32> to vector<1x96xf32>
    %61 = vector.shape_cast %60 : vector<1x96xf32> to vector<96xf32>
    %62 = arith.extf %59 : vector<2x8x8x96xbf16> to vector<2x8x8x96xf32>
    %63 = vector.shape_cast %61 : vector<96xf32> to vector<1x1x1x96xf32>
    %64 = vector.broadcast %63 : vector<1x1x1x96xf32> to vector<2x8x8x96xf32>
    %65 = arith.mulf %62, %64 : vector<2x8x8x96xf32>
    %66 = arith.addf %58, %65 : vector<2x8x8x96xf32>
    %67 = vector.extract_strided_slice %11 {offsets = [0, 2, 0, 0], sizes = [2, 8, 8, 96], strides = [1, 1, 1, 1]} : vector<2x10x8x96xbf16> to vector<2x8x8x96xbf16>
    %68 = vector.extract_strided_slice %14 {offsets = [6, 0], sizes = [1, 96], strides = [1, 1]} : vector<9x96xf32> to vector<1x96xf32>
    %69 = vector.shape_cast %68 : vector<1x96xf32> to vector<96xf32>
    %70 = arith.extf %67 : vector<2x8x8x96xbf16> to vector<2x8x8x96xf32>
    %71 = vector.shape_cast %69 : vector<96xf32> to vector<1x1x1x96xf32>
    %72 = vector.broadcast %71 : vector<1x1x1x96xf32> to vector<2x8x8x96xf32>
    %73 = arith.mulf %70, %72 : vector<2x8x8x96xf32>
    %74 = arith.addf %66, %73 : vector<2x8x8x96xf32>
    %75 = vector.extract_strided_slice %12 {offsets = [0, 2, 0, 0], sizes = [2, 8, 8, 96], strides = [1, 1, 1, 1]} : vector<2x10x8x96xbf16> to vector<2x8x8x96xbf16>
    %76 = vector.extract_strided_slice %14 {offsets = [7, 0], sizes = [1, 96], strides = [1, 1]} : vector<9x96xf32> to vector<1x96xf32>
    %77 = vector.shape_cast %76 : vector<1x96xf32> to vector<96xf32>
    %78 = arith.extf %75 : vector<2x8x8x96xbf16> to vector<2x8x8x96xf32>
    %79 = vector.shape_cast %77 : vector<96xf32> to vector<1x1x1x96xf32>
    %80 = vector.broadcast %79 : vector<1x1x1x96xf32> to vector<2x8x8x96xf32>
    %81 = arith.mulf %78, %80 : vector<2x8x8x96xf32>
    %82 = arith.addf %74, %81 : vector<2x8x8x96xf32>
    %83 = vector.extract_strided_slice %13 {offsets = [0, 2, 0, 0], sizes = [2, 8, 8, 96], strides = [1, 1, 1, 1]} : vector<2x10x8x96xbf16> to vector<2x8x8x96xbf16>
    %84 = vector.extract_strided_slice %14 {offsets = [8, 0], sizes = [1, 96], strides = [1, 1]} : vector<9x96xf32> to vector<1x96xf32>
    %85 = vector.shape_cast %84 : vector<1x96xf32> to vector<96xf32>
    %86 = arith.extf %83 : vector<2x8x8x96xbf16> to vector<2x8x8x96xf32>
    %87 = vector.shape_cast %85 : vector<96xf32> to vector<1x1x1x96xf32>
    %88 = vector.broadcast %87 : vector<1x1x1x96xf32> to vector<2x8x8x96xf32>
    %89 = arith.mulf %86, %88 : vector<2x8x8x96xf32>
    %90 = arith.addf %82, %89 : vector<2x8x8x96xf32>
    %cst_30 = arith.constant 0.000000e+00 : f32
    %91 = vector.broadcast %cst_30 : f32 to vector<2x8x8x96xf32>
    %92 = arith.maximumf %90, %91 : vector<2x8x8x96xf32>
    %93 = vector.shape_cast %92 : vector<2x8x8x96xf32> to vector<128x96xf32>
    %94 = arith.truncf %93 : vector<128x96xf32> to vector<128x96xbf16>
    %c0_31 = arith.constant 0 : index
    %c0_32 = arith.constant 0 : index
    %95 = vector.load %arg4[%c0_31, %c0_32] : memref<96x128xbf16, #tpu.memory_space<vmem>>, vector<96x128xbf16>
    %cst_33 = arith.constant dense<0.000000e+00> : vector<128x128xf32>
    %96 = tpu.matmul %94, %95, %cst_33 {dimension_numbers = #tpu.dot_dimension_numbers<[1], [0], [0], [1], [0, 0, 1, 1], [], []>} : vector<128x96xbf16>, vector<96x128xbf16>, vector<128x128xf32> -> vector<128x128xf32>
    %c0_34 = arith.constant 0 : index
    %c0_35 = arith.constant 0 : index
    %97 = vector.load %arg5[%c0_34, %c0_35] : memref<1x128xf32, #tpu.memory_space<vmem>>, vector<1x128xf32>
    %98 = vector.shape_cast %97 : vector<1x128xf32> to vector<128xf32>
    %99 = vector.shape_cast %98 : vector<128xf32> to vector<1x128xf32>
    %100 = vector.broadcast %99 : vector<1x128xf32> to vector<128x128xf32>
    %101 = arith.addf %96, %100 : vector<128x128xf32>
    %102 = vector.shape_cast %101 : vector<128x128xf32> to vector<2x64x128xf32>
    %103 = arith.truncf %102 : vector<2x64x128xf32> to vector<2x64x128xbf16>
    %c0_36 = arith.constant 0 : index
    %c0_37 = arith.constant 0 : index
    %c0_38 = arith.constant 0 : index
    %104 = vector.load %arg6[%c0_36, %c0_37, %c0_38] : memref<2x64x128xbf16, #tpu.memory_space<vmem>>, vector<2x64x128xbf16>
    tpu.vector_store %arg6[%c0_36, %c0_37, %c0_38], %103 {strides = array<i32>} : memref<2x64x128xbf16, #tpu.memory_space<vmem>>, vector<2x64x128xbf16>,
    return
  }
  func.func @transform_0(%arg0: i32) -> (i32, i32, i32, i32) {
    %c0_i32 = arith.constant 0 : i32
    %c0_i32_0 = arith.constant 0 : i32
    %c0_i32_1 = arith.constant 0 : i32
    %c0_i32_2 = arith.constant 0 : i32
    return %arg0, %c0_i32, %c0_i32_0, %c0_i32_1 : i32, i32, i32, i32
  }
  func.func @transform_1(%arg0: i32) -> (i32, i32) {
    %c0_i32 = arith.constant 0 : i32
    %c0_i32_0 = arith.constant 0 : i32
    %c0_i32_1 = arith.constant 0 : i32
    return %c0_i32, %c0_i32_0 : i32, i32
  }
  func.func @transform_2(%arg0: i32) -> (i32, i32) {
    %c0_i32 = arith.constant 0 : i32
    %c0_i32_0 = arith.constant 0 : i32
    %c0_i32_1 = arith.constant 0 : i32
    return %c0_i32, %c0_i32_0 : i32, i32
  }
  func.func @transform_3(%arg0: i32) -> (i32, i32) {
    %c0_i32 = arith.constant 0 : i32
    %c0_i32_0 = arith.constant 0 : i32
    %c0_i32_1 = arith.constant 0 : i32
    return %c0_i32, %c0_i32_0 : i32, i32
  }
  func.func @transform_4(%arg0: i32) -> (i32, i32) {
    %c0_i32 = arith.constant 0 : i32
    %c0_i32_0 = arith.constant 0 : i32
    %c0_i32_1 = arith.constant 0 : i32
    return %c0_i32, %c0_i32_0 : i32, i32
  }
  func.func @transform_5(%arg0: i32) -> (i32, i32, i32) {
    %c0_i32 = arith.constant 0 : i32
    %c0_i32_0 = arith.constant 0 : i32
    %c0_i32_1 = arith.constant 0 : i32
    return %arg0, %c0_i32, %c0_i32_0 : i32, i32, i32
  }
}

</mosaic_0001>

<bundles_post_ra>
// kernel: conv_projection.1
= control target key start
LH: loop header
LB: loop body
LE: loop exit
PB: predicated region body
PF: predicated region fallthrough
CT: control target
= control target key end

     0   :  { %vm23_vm0 = vcmask 778240   ;;  %vm34_vm1 = vsmask.f32 256  ;;  %s2263_s30 = smov 32   ;;  %vm84_vm2 = vsmask.f32 7938  ;;  %s3326_s0 = inlined_call_operand.vmem [shape: f32[2,8,8,32], index: 0, kind: input, shape index: {}]   ;;  %s3327_s3 = inlined_call_operand.vmem [shape: bf16[96,128], index: 3, kind: input, shape index: {}]   ;;  %s3328_s1 = inlined_call_operand.vmem [shape: f32[9,96], index: 1, kind: input, shape index: {}]   ;;  %s3329_s2 = inlined_call_operand.vmem [shape: f32[1,96], index: 2, kind: input, shape index: {}]   ;;  %s3330_s4 = inlined_call_operand.vmem [shape: f32[1,128], index: 4, kind: input, shape index: {}]   ;;  %s3331_s5 = inlined_call_operand.vmem [shape: bf16[2,64,128], index: 5, kind: output, shape index: {}]  }
   0x1   :  { %v2299_v0 = vld [vmem:[%s3326_s0 + $0x48] sm:$0xff]  ;;  %v2304_v1 = vld [vmem:[%s3326_s0 + $0x50] sm:$0xff]  ;;  %v2309_v2 = vld [vmem:[%s3326_s0] sm:$0xff]  ;;  %vm21_vm3 = vcmask 781312   ;;  %s2264_s10 = smov 64   ;;  %vm262_vm7 = vcmask 261120  }
   0x2   :  { %v2185_v3 = vpack.i.bf16 %v2304_v1, %v2299_v0  ;;  %v2316_v4 = vld [vmem:[%s3326_s0 + $0x40] sm:$0xff]  ;;  %v2321_v5 = vld [vmem:[%s3326_s0 + $0x8] sm:$0xff]  ;;  %v2326_v6 = vld [vmem:[%s3326_s0 + $0x10] sm:$0xff]  ;;  %vm279_vm8 = vcmask 523264   ;;  %vm803_vm9 = vcmask 1046528   ;;  %vm952_vm10 = vcmask 1045504  }
   0x3   :  { %v2175_v7 = vpack.i.bf16 %v2316_v4, %v2309_v2  ;;  %v2180_v8 = vpack.i.bf16 %v2326_v6, %v2321_v5  ;;  %vm2335_vm4 = vmand %vm23_vm0, %vm34_vm1  ;;  %v36_v10 = vld [vmem:[#allocation2 + $0x8] sm:$0x1]  ;;  %v2342_v11 = vld [vmem:[%s3326_s0 + $0x20] sm:$0xff]  ;;  %vm1784_vm11 = vcmask 785408  }
   0x4   :  { %2186 = vrot.lane.b32.xlu1 %v2185_v3, %s2263_s30  ;;  %v2347_v12 = vld [vmem:[%s3326_s0 + $0x60] sm:$0xff]  ;;  %v37_v13 = vsel %vm2335_vm4, 0, %v36_v10  ;;  %v60_v14 = vld [vmem:[#allocation2 + $0x58] sm:$0x1]  ;;  %vm2353_vm5 = vmand %vm23_vm0, %vm84_vm2 }
   0x5   :  { %2176 = vrot.lane.b32.xlu0 %v2175_v7, %s2263_s30  ;;  %v86_v16 = vld [vmem:[#allocation2 + $0xc] sm:$0x1]  ;;  %v2361_v17 = vld [vmem:[%s3326_s0 + $0x18] sm:$0xff]  ;;  %38 = vst [vmem:[#allocation2 + $0x8] sm:$0x1] %v37_v13  ;;  %v61_v19 = vsel %vm2335_vm4, 0, %v60_v14  ;;  %vm2374_vm6 = vmand %vm21_vm3, %vm84_vm2  ;;  %v2210_v36 = vpack.i.bf16 %v2347_v12, %v2342_v11 }
   0x6   :  { %v2366_v18 = vld [vmem:[%s3326_s0 + $0x58] sm:$0xff]  ;;  %v87_v20 = vsel %vm2353_vm5, 0, %v86_v16  ;;  %v63_v23 = vld [vmem:[#allocation2 + $0x60] sm:$0x1]  ;;  %62 = vst [vmem:[#allocation2 + $0x58] sm:$0x1] %v61_v19 }
   0x7   :  { %v110_v21 = vld [vmem:[#allocation2 + $0x5c] sm:$0x1]  ;;  %88 = vst [vmem:[#allocation2 + $0xc] sm:$0x1] %v87_v20  ;;  %v64_v25 = vsel %vm2335_vm4, 0, %v63_v23  ;;  %v2205_v40 = vpack.i.bf16 %v2366_v18, %v2361_v17  ;;  %v2404_v41 = vld [vmem:[%s3326_s0 + $0x28] sm:$0xff] }
   0x8   :  { %2191 = vrot.lane.b32.xlu1 %v2175_v7, %s2264_s10  ;;  %v111_v24 = vsel %vm2353_vm5, 0, %v110_v21  ;;  %v66_v26 = vld [vmem:[#allocation2 + $0x68] sm:$0x1]  ;;  %v113_v27 = vld [vmem:[#allocation2 + $0x64] sm:$0x1]  ;;  %v2409_v42 = vld [vmem:[%s3326_s0 + $0x30] sm:$0xff] }
   0x9   :  { %2181 = vrot.lane.b32.xlu0 %v2180_v8, %s2263_s30  ;;  %112 = vst [vmem:[#allocation2 + $0x5c] sm:$0x1] %v111_v24  ;;  %65 = vst [vmem:[#allocation2 + $0x60] sm:$0x1] %v64_v25  ;;  %v67_v28 = vsel %vm2335_vm4, 0, %v66_v26  ;;  %v114_v29 = vsel %vm2353_vm5, 0, %v113_v27  ;;  %v2220_v46 = vpack.i.bf16 %v2409_v42, %v2404_v41 }
   0xa   :  { %v116_v30 = vld [vmem:[#allocation2 + $0x6c] sm:$0x1]  ;;  %v39_v31 = vld [vmem:[#allocation2 + $0x10] sm:$0x1]  ;;  %68 = vst [vmem:[#allocation2 + $0x68] sm:$0x1] %v67_v28 }
   0xb   :  { %115 = vst [vmem:[#allocation2 + $0x64] sm:$0x1] %v114_v29  ;;  %v117_v32 = vsel %vm2353_vm5, 0, %v116_v30  ;;  %v40_v33 = vsel %vm2335_vm4, 0, %v39_v31  ;;  %v42_v34 = vld [vmem:[#allocation2 + $0x18] sm:$0x1] }
   0xc   :  { %v89_v35 = vld [vmem:[#allocation2 + $0x14] sm:$0x1]  ;;  %2201 = vrot.lane.b32.xlu1 %v2185_v3, %s2264_s10  ;;  %118 = vst [vmem:[#allocation2 + $0x6c] sm:$0x1] %v117_v32  ;;  %41 = vst [vmem:[#allocation2 + $0x10] sm:$0x1] %v40_v33 }
   0xd   :  { %v43_v37 = vsel %vm2335_vm4, 0, %v42_v34  ;;  %v90_v38 = vsel %vm2353_vm5, 0, %v89_v35  ;;  %v92_v39 = vld [vmem:[#allocation2 + $0x1c] sm:$0x1]  ;;  %2196 = vrot.lane.b32.xlu0 %v2180_v8, %s2264_s10  ;;  %v45_v44 = vld [vmem:[#allocation2 + $0x20] sm:$0x1] }
   0xe   :  { %44 = vst [vmem:[#allocation2 + $0x18] sm:$0x1] %v43_v37  ;;  %91 = vst [vmem:[#allocation2 + $0x14] sm:$0x1] %v90_v38  ;;  %v93_v43 = vsel %vm2353_vm5, 0, %v92_v39  ;;  %v46_v47 = vsel %vm2335_vm4, 0, %v45_v44 }
   0xf   :  { %94 = vst [vmem:[#allocation2 + $0x1c] sm:$0x1] %v93_v43  ;;  %v69_v45 = vld [vmem:[#allocation2 + $0x70] sm:$0x1]  ;;  %47 = vst [vmem:[#allocation2 + $0x20] sm:$0x1] %v46_v47 }
  0x10   :  { %2211 = vrot.lane.b32.xlu1 %v2210_v36, %s2263_s30  ;;  %v70_v48 = vsel %vm2335_vm4, 0, %v69_v45  ;;  %v95_v49 = vld [vmem:[#allocation2 + $0x24] sm:$0x1]  ;;  %v2424_v50 = vld [vmem:[%s3326_s0 + $0x68] sm:$0xff]  ;;  %v2429_v51 = vld [vmem:[%s3326_s0 + $0x70] sm:$0xff]  ;;  %v2265_v8 = vmov 0  }
  0x11   :  { %2206 = vrot.lane.b32.xlu0 %v2205_v40, %s2263_s30  ;;  %71 = vst [vmem:[#allocation2 + $0x70] sm:$0x1] %v70_v48  ;;  %v96_v52 = vsel %vm2353_vm5, 0, %v95_v49  ;;  %v119_v53 = vld [vmem:[#allocation2 + $0x74] sm:$0x1]  ;;  %v2225_v55 = vpack.i.bf16 %v2429_v51, %v2424_v50  ;;  %v2451_v3 = vld [vmem:[%s3326_s0 + $0x38] sm:$0xff]  ;;  %v683_v48 = vlaneseq }
  0x12   :  { %97 = vst [vmem:[#allocation2 + $0x24] sm:$0x1] %v96_v52  ;;  %v120_v54 = vsel %vm2353_vm5, 0, %v119_v53  ;;  %v48_v56 = vld [vmem:[#allocation2 + $0x28] sm:$0x1]  ;;  %v2465_v10 = vld [vmem:[%s3326_s0 + $0x78] sm:$0xff] }
  0x13   :  { %121 = vst [vmem:[#allocation2 + $0x74] sm:$0x1] %v120_v54  ;;  %v72_v57 = vld [vmem:[#allocation2 + $0x78] sm:$0x1]  ;;  %v49_v58 = vsel %vm2335_vm4, 0, %v48_v56  ;;  %v2250_v26 = vpack.i.bf16 %v2465_v10, %v2451_v3  ;;  %v2256_v44 = vld [vmem:[%s3327_s3 + $0x8] sm:$0xff]  }
  0x14   :  { %2221 = vrot.lane.b32.xlu1 %v2220_v46, %s2263_s30  ;;  %v73_v59 = vsel %vm2335_vm4, 0, %v72_v57  ;;  %v98_v60 = vld [vmem:[#allocation2 + $0x2c] sm:$0x1]  ;;  %v122_v61 = vld [vmem:[#allocation2 + $0x7c] sm:$0x1]  ;;  %v2257_v45 = vld [vmem:[%s3327_s3 + $0x10] sm:$0xff]  }
  0x15   :  { %2216 = vrot.lane.b32.xlu0 %v2205_v40, %s2264_s10  ;;  %50 = vst [vmem:[#allocation2 + $0x28] sm:$0x1] %v49_v58  ;;  %74 = vst [vmem:[#allocation2 + $0x78] sm:$0x1] %v73_v59  ;;  %v99_v62 = vsel %vm2353_vm5, 0, %v98_v60  ;;  %v123_v63 = vsel %vm2353_vm5, 0, %v122_v61 }
  0x16   :  { %100 = vst [vmem:[#allocation2 + $0x2c] sm:$0x1] %v99_v62  ;;  %124 = vst [vmem:[#allocation2 + $0x7c] sm:$0x1] %v123_v63  ;;  %v75_v7 = vld [vmem:[#allocation2 + $0x80] sm:$0x1] }
  0x17   :  { %22 = vst.msk [vmem:[#allocation2] sm:$0xf] %vm21_vm3, %v2265_v8  ;;  %25 = vst.msk [vmem:[#allocation2 + $0x50] sm:$0xf] %vm21_vm3, %v2265_v8  ;;  %v76_v13 = vsel %vm2335_vm4, 0, %v75_v7  ;;  %v2255_v40 = vld [vmem:[%s3327_s3] sm:$0xff]  }
  0x18   :  { %2231 = vrot.lane.b32.xlu1 %v2210_v36, %s2264_s10  ;;  %24 = vst.msk [vmem:[#allocation2 + $0x4] sm:$0x1] %vm23_vm0, %v2265_v8  ;;  %26 = vst.msk [vmem:[#allocation2 + $0x54] sm:$0x1] %vm23_vm0, %v2265_v8  ;;  %v78_v14 = vld [vmem:[#allocation2 + $0x88] sm:$0x1]  ;;  %2132 = vmatprep.subr.bf16.mxu0 %v2255_v40 }
  0x19   :  { %28 = vst.msk [vmem:[#allocation2 + $0x48] sm:$0xf] %vm21_vm3, %v2265_v8  ;;  %30 = vst.msk [vmem:[#allocation2 + $0x98] sm:$0xf] %vm21_vm3, %v2265_v8  ;;  %2226 = vrot.lane.b32.xlu0 %v2225_v55, %s2263_s30  ;;  %v125_v16 = vld [vmem:[#allocation2 + $0x84] sm:$0x1]  ;;  %2160 = vmatprep.subr.bf16.mxu1 %v2255_v40 }
  0x1a   :  { %29 = vst.msk [vmem:[#allocation2 + $0x4c] sm:$0x1] %vm23_vm0, %v2265_v8  ;;  %31 = vst.msk [vmem:[#allocation2 + $0x9c] sm:$0x1] %vm23_vm0, %v2265_v8  ;;  %v79_v19 = vsel %vm2335_vm4, 0, %v78_v14  ;;  %v126_v20 = vsel %vm2353_vm5, 0, %v125_v16  ;;  %2133 = vmatpush3.bf16.msra.mxu0 %v2255_v40  ;;  %2166 = vmatpush3.bf16.msra.mxu1 %v2255_v40 }
  0x1b   :  { %77 = vst [vmem:[#allocation2 + $0x80] sm:$0x1] %v76_v13  ;;  %v128_v21 = vld [vmem:[#allocation2 + $0x8c] sm:$0x1]  ;;  %80 = vst [vmem:[#allocation2 + $0x88] sm:$0x1] %v79_v19  ;;  %2134 = vmatprep.subr.bf16.mxu0 %v2256_v44  ;;  %2161 = vmatprep.subr.bf16.mxu1 %v2256_v44 }
  0x1c   :  { %127 = vst [vmem:[#allocation2 + $0x84] sm:$0x1] %v126_v20  ;;  %v129_v23 = vsel %vm2353_vm5, 0, %v128_v21  ;;  %v51_v24 = vld [vmem:[#allocation2 + $0x30] sm:$0x1]  ;;  %2241 = vrot.lane.b32.xlu1 %v2225_v55, %s2264_s10  ;;  %v2258_v15 = vld [vmem:[%s3327_s3 + $0x18] sm:$0xff]  }
  0x1d   :  { %v54_v25 = vld [vmem:[#allocation2 + $0x38] sm:$0x1]  ;;  %130 = vst [vmem:[#allocation2 + $0x8c] sm:$0x1] %v129_v23  ;;  %v52_v27 = vsel %vm2335_vm4, 0, %v51_v24  ;;  %2236 = vrot.lane.b32.xlu0 %v2220_v46, %s2264_s10  ;;  %v2259_v46 = vld [vmem:[%s3327_s3 + $0x20] sm:$0xff]  }
  0x1e   :  { %v55_v28 = vsel %vm2335_vm4, 0, %v54_v25  ;;  %v101_v29 = vld [vmem:[#allocation2 + $0x34] sm:$0x1]  ;;  %53 = vst [vmem:[#allocation2 + $0x30] sm:$0x1] %v52_v27  ;;  %2135 = vmatpush3.bf16.msra.mxu0 %v2256_v44  ;;  %2167 = vmatpush3.bf16.msra.mxu1 %v2256_v44  ;;  %v2260_v47 = vld [vmem:[%s3327_s3 + $0x28] sm:$0xff]  }
  0x1f   :  { %56 = vst [vmem:[#allocation2 + $0x38] sm:$0x1] %v55_v28  ;;  %v102_v30 = vsel %vm2353_vm5, 0, %v101_v29  ;;  %v104_v31 = vld [vmem:[#allocation2 + $0x3c] sm:$0x1]  ;;  %2136 = vmatprep.subr.bf16.mxu0 %v2257_v45  ;;  %2162 = vmatprep.subr.bf16.mxu1 %v2257_v45  ;;  %v684_v49 = vshrl.u32 %v683_v48, 7 }
  0x20   :  { %103 = vst [vmem:[#allocation2 + $0x34] sm:$0x1] %v102_v30  ;;  %v105_v32 = vsel %vm2353_vm5, 0, %v104_v31  ;;  %2251 = vrot.lane.b32.xlu1 %v2250_v26, %s2264_s10  ;;  %v57_v33 = vld [vmem:[#allocation2 + $0x40] sm:$0x1] }
  0x21   :  { %106 = vst [vmem:[#allocation2 + $0x3c] sm:$0x1] %v105_v32  ;;  %2246 = vrot.lane.b32.xlu0 %v2250_v26, %s2263_s30  ;;  %v81_v34 = vld [vmem:[#allocation2 + $0x90] sm:$0x1]  ;;  %v58_v35 = vsel %vm2335_vm4, 0, %v57_v33  ;;  %v737_v52 = vsub.s32 1, %v684_v49 }
  0x22   :  { %v82_v36 = vsel %vm2335_vm4, 0, %v81_v34  ;;  %v107_v37 = vld [vmem:[#allocation2 + $0x44] sm:$0x1]  ;;  %59 = vst [vmem:[#allocation2 + $0x40] sm:$0x1] %v58_v35  ;;  %2137 = vmatpush3.bf16.msra.mxu0 %v2257_v45  ;;  %2168 = vmatpush3.bf16.msra.mxu1 %v2257_v45  ;;  %v886_v55 = vsub.s32 2, %v684_v49 }
  0x23   :  { %83 = vst [vmem:[#allocation2 + $0x90] sm:$0x1] %v82_v36  ;;  %v108_v38 = vsel %vm2353_vm5, 0, %v107_v37  ;;  %v131_v39 = vld [vmem:[#allocation2 + $0x94] sm:$0x1]  ;;  %2138 = vmatprep.subr.bf16.mxu0 %v2258_v15  ;;  %2163 = vmatprep.subr.bf16.mxu1 %v2258_v15  ;;  %v658_v54 = vld [vmem:[%s3328_s1] sm:$0xff] }
  0x24   :  { %109 = vst [vmem:[#allocation2 + $0x44] sm:$0x1] %v108_v38  ;;  %v132_v43 = vsel %vm2353_vm5, 0, %v131_v39  ;;  %v619_v53 = vld [vmem:[#allocation2 + $0x4] sm:$0x1]  ;;  %v2518_v57 = vrot.slane %v658_v54, %v737_v52  ;;  %v2520_v58 = vrot.slane %v658_v54, %v886_v55  ;;  %v685_v60 = vsub.s32 0, %v684_v49 }
  0x25   :  { %133 = vst [vmem:[#allocation2 + $0x94] sm:$0x1] %v132_v43  ;;  %v719_v56 = vunpack.c.l.bf16 %v619_v53  ;;  %v639_v59 = vld [vmem:[#allocation2 + $0x54] sm:$0x1]  ;;  %v1037_v61 = vsub.s32 3, %v684_v49  ;;  %v1075_v63 = vsub.s32 4, %v684_v49 }
  0x26   :  { %2139 = vmatpush3.bf16.msra.mxu0 %v2258_v15  ;;  %2169 = vmatpush3.bf16.msra.mxu1 %v2258_v15  ;;  %v727_v7 = vunpack.c.l.bf16 %v639_v59  ;;  %v1223_v14 = vsub.s32 5, %v684_v49  ;;  %v1373_v19 = vsub.s32 6, %v684_v49  ;;  %v1411_v20 = vsub.s32 7, %v684_v49 }
  0x27   :  { %2140 = vmatprep.subr.bf16.mxu0 %v2259_v46  ;;  %2164 = vmatprep.subr.bf16.mxu1 %v2259_v46  ;;  %v2523_v62 = vmul.f32 %v2518_v57, %v719_v56  ;;  %v2526_v13 = vmul.f32 %v2520_v58, %v719_v56  ;;  %v2528_v24 = vrot.slane %v658_v54, %v685_v60 }
  0x28   :  { %v2530_v25 = vrot.slane %v658_v54, %v1037_v61  ;;  %v2533_v27 = vrot.slane %v658_v54, %v1075_v63  ;;  %v2536_v28 = vmul.f32 %v2518_v57, %v727_v7  ;;  %v2539_v29 = vmul.f32 %v2520_v58, %v727_v7 }
  0x29   :  { %v805_v26 = vrot.slane %v2523_v62, 1  ;;  %v954_v33 = vrot.slane %v2526_v13, 2  ;;  %v2542_v34 = vrot.slane %v658_v54, %v1223_v14  ;;  %v2544_v38 = vrot.slane %v658_v54, %v1373_v19  ;;  %v522_v19 = vld [vmem:[#allocation2 + $0x8] sm:$0xf] }
  0x2a   :  { %2141 = vmatpush3.bf16.msra.mxu0 %v2259_v46  ;;  %2170 = vmatpush3.bf16.msra.mxu1 %v2259_v46  ;;  %v2546_v39 = vrot.slane %v658_v54, %v1411_v20  ;;  %v978_v48 = vrot.slane %v2539_v29, 2 }
  0x2b   :  { %2142 = vmatprep.subr.bf16.mxu0 %v2260_v47  ;;  %2165 = vmatprep.subr.bf16.mxu1 %v2260_v47 }
  0x2e   :  { %2143 = vmatpush3.bf16.msra.mxu0 %v2260_v47  ;;  %2171 = vmatpush3.bf16.msra.mxu1 %v2260_v47  ;;  %v829_v47 = vrot.slane %v2536_v28, 1 }
  0x76   :  { %v2187_v8 = vpop.permute.xlu1 %2186 }
  0x77   :  { %v2177_v16 = vpop.permute.xlu0 %2176  ;;  %v2189_v30 = vunpack.i.h.bf16 %v2187_v8  ;;  %v2188_v31 = vunpack.i.l.bf16 %v2187_v8 }
  0x78   :  { %v2179_v21 = vunpack.i.h.bf16 %v2177_v16  ;;  %v2178_v23 = vunpack.i.l.bf16 %v2177_v16 }
  0x79   :  { %v273_v49 = vsel %vm262_vm7, %v2304_v1, %v2189_v30  ;;  %v272_v52 = vsel %vm262_vm7, %v2299_v0, %v2188_v31  ;;  %v570_v31 = vld [vmem:[#allocation2 + $0x58] sm:$0xf] }
  0x7a   :  { %v2192_v32 = vpop.permute.xlu1 %2191  ;;  %v271_v40 = vsel %vm262_vm7, %v2316_v4, %v2179_v21  ;;  %v263_v43 = vsel %vm262_vm7, %v2309_v2, %v2178_v23 }
  0x7b   :  { %v2194_v35 = vunpack.i.h.bf16 %v2192_v32  ;;  %v2193_v36 = vunpack.i.l.bf16 %v2192_v32  ;;  %v2182_v37 = vpop.permute.xlu0 %2181  ;;  %v573_v32 = vld [vmem:[#allocation2 + $0x5c] sm:$0x1] }
  0x7c   :  { %v2184_v44 = vunpack.i.h.bf16 %v2182_v37  ;;  %v2183_v45 = vunpack.i.l.bf16 %v2182_v37 }
  0x7d   :  { %v280_v15 = vsel %vm279_vm8, %v263_v43, %v2193_v36  ;;  %v288_v46 = vsel %vm279_vm8, %v271_v40, %v2194_v35 }
  0x7e   :  { %v2039_v4 = vpack.c.bf16 %v280_v15, %v280_v15  ;;  %v2047_v53 = vpack.c.bf16 %v288_v46, %v288_v46  ;;  %v2202_v54 = vpop.permute.xlu1 %2201  ;;  %v265_v2 = vsel %vm262_vm7, %v2326_v6, %v2184_v44  ;;  %v264_v55 = vsel %vm262_vm7, %v2321_v5, %v2183_v45  ;;  %v525_v5 = vld [vmem:[#allocation2 + $0xc] sm:$0x1] }
  0x7f   :  { %v2204_v56 = vunpack.i.h.bf16 %v2202_v54  ;;  %v2203_v59 = vunpack.i.l.bf16 %v2202_v54  ;;  %v2197_v60 = vpop.permute.xlu0 %2196 }
  0x80   :  { %v361_v61 = vshrl.u32 %v2039_v4, 16  ;;  %v364_v63 = vshll.u32 %v2039_v4, 16  ;;  %v425_v7 = vshrl.u32 %v2047_v53, 16  ;;  %v428_v8 = vshll.u32 %v2047_v53, 16 }
  0x81   :  { %v290_v1 = vsel %vm279_vm8, %v273_v49, %v2204_v56  ;;  %v289_v0 = vsel %vm279_vm8, %v272_v52, %v2203_v59  ;;  %v2199_v14 = vunpack.i.h.bf16 %v2197_v60  ;;  %v2198_v16 = vunpack.i.l.bf16 %v2197_v60  ;;  %v576_v60 = vld [vmem:[#allocation2 + $0x60] sm:$0xf] }
  0x82   :  { %v363_v20 = vrot.slane %v361_v61, 7  ;;  %v427_v21 = vrot.slane %v425_v7, 7  ;;  %v2049_v6 = vpack.c.bf16 %v290_v1, %v290_v1  ;;  %v2048_v23 = vpack.c.bf16 %v289_v0, %v289_v0  ;;  %v2212_v30 = vpop.permute.xlu1 %2211  ;;  %v579_v0 = vld [vmem:[#allocation2 + $0x64] sm:$0x1] }
  0x83   :  { %v281_v35 = vsel %vm279_vm8, %v264_v55, %v2198_v16  ;;  %v282_v36 = vsel %vm279_vm8, %v265_v2, %v2199_v14  ;;  %v2214_v37 = vunpack.i.h.bf16 %v2212_v30  ;;  %v2213_v40 = vunpack.i.l.bf16 %v2212_v30  ;;  %v2207_v43 = vpop.permute.xlu0 %2206  ;;  %v582_v14 = vld [vmem:[#allocation2 + $0x68] sm:$0xf]  ;;  %v585_v16 = vld [vmem:[#allocation2 + $0x6c] sm:$0x1] }
  0x84   :  { %v366_v44 = vor.u32 %v364_v63, %v363_v20  ;;  %v367_v45 = vrot.slane %v363_v20, 4  ;;  %v430_v15 = vor.u32 %v428_v8, %v427_v21  ;;  %v431_v46 = vrot.slane %v427_v21, 4 }
  0x85   :  { %v441_v49 = vshrl.u32 %v2049_v6, 16  ;;  %v444_v52 = vshll.u32 %v2049_v6, 16  ;;  %v433_v4 = vshrl.u32 %v2048_v23, 16  ;;  %v436_v53 = vshll.u32 %v2048_v23, 16 }
  0x86   :  { %v523_v54 = vsel %vm2374_vm6, %v366_v44, %v522_v19  ;;  %v526_v56 = vsel %vm2335_vm4, %v367_v45, %v525_v5  ;;  %v571_v2 = vsel %vm2374_vm6, %v430_v15, %v570_v31  ;;  %v574_v55 = vsel %vm2335_vm4, %v431_v46, %v573_v32  ;;  %v2222_v59 = vpop.permute.xlu1 %2221 }
  0x87   :  { %524 = vst [vmem:[#allocation2 + $0x8] sm:$0xf] %v523_v54  ;;  %527 = vst [vmem:[#allocation2 + $0xc] sm:$0x1] %v526_v56  ;;  %v443_v61 = vrot.slane %v441_v49, 7  ;;  %v435_v63 = vrot.slane %v433_v4, 7  ;;  %v2040_v7 = vpack.c.bf16 %v281_v35, %v281_v35  ;;  %v2041_v8 = vpack.c.bf16 %v282_v36, %v282_v36  ;;  %v2217_v1 = vpop.permute.xlu0 %2216 }
  0x88   :  { %572 = vst [vmem:[#allocation2 + $0x58] sm:$0xf] %v571_v2  ;;  %575 = vst [vmem:[#allocation2 + $0x5c] sm:$0x1] %v574_v55  ;;  %v2578_v19 = vsel %vm262_vm7, %v2347_v12, %v2214_v37  ;;  %v2582_v20 = vsel %vm262_vm7, %v2342_v11, %v2213_v40  ;;  %v2209_v21 = vunpack.i.h.bf16 %v2207_v43  ;;  %v2208_v6 = vunpack.i.l.bf16 %v2207_v43  ;;  %v528_v40 = vld [vmem:[#allocation2 + $0x10] sm:$0xf] }
  0x89   :  { %v446_v23 = vor.u32 %v444_v52, %v443_v61  ;;  %v447_v30 = vrot.slane %v443_v61, 4  ;;  %v438_v5 = vor.u32 %v436_v53, %v435_v63  ;;  %v439_v31 = vrot.slane %v435_v63, 4  ;;  %v531_v53 = vld [vmem:[#allocation2 + $0x14] sm:$0x1]  ;;  %v534_v54 = vld [vmem:[#allocation2 + $0x18] sm:$0xf] }
  0x8a   :  { %v369_v32 = vshrl.u32 %v2040_v7, 16  ;;  %v372_v35 = vshll.u32 %v2040_v7, 16  ;;  %v377_v36 = vshrl.u32 %v2041_v8, 16  ;;  %v380_v44 = vshll.u32 %v2041_v8, 16  ;;  %v2232_v45 = vpop.permute.xlu1 %2231  ;;  %v537_v56 = vld [vmem:[#allocation2 + $0x1c] sm:$0x1] }
  0x8b   :  { %v583_v15 = vsel %vm2374_vm6, %v446_v23, %v582_v14  ;;  %v586_v12 = vsel %vm2335_vm4, %v447_v30, %v585_v16  ;;  %v577_v11 = vsel %vm2374_vm6, %v438_v5, %v576_v60  ;;  %v580_v37 = vsel %vm2335_vm4, %v439_v31, %v579_v0  ;;  %v2227_v4 = vpop.permute.xlu0 %2226 }
  0x8c   :  { %584 = vst [vmem:[#allocation2 + $0x68] sm:$0xf] %v583_v15  ;;  %587 = vst [vmem:[#allocation2 + $0x6c] sm:$0x1] %v586_v12  ;;  %v371_v43 = vrot.slane %v369_v32, 7  ;;  %v379_v46 = vrot.slane %v377_v36, 7  ;;  %v274_v49 = vsel %vm262_vm7, %v2366_v18, %v2209_v21  ;;  %v266_v52 = vsel %vm262_vm7, %v2361_v17, %v2208_v6 }
  0x8d   :  { %578 = vst [vmem:[#allocation2 + $0x60] sm:$0xf] %v577_v11  ;;  %581 = vst [vmem:[#allocation2 + $0x64] sm:$0x1] %v580_v37  ;;  %v2224_v2 = vunpack.i.h.bf16 %v2222_v59  ;;  %v2223_v55 = vunpack.i.l.bf16 %v2222_v59  ;;  %v2219_v60 = vunpack.i.h.bf16 %v2217_v1  ;;  %v2218_v61 = vunpack.i.l.bf16 %v2217_v1 }
  0x8e   :  { %v374_v63 = vor.u32 %v372_v35, %v371_v43  ;;  %v375_v7 = vrot.slane %v371_v43, 4  ;;  %v382_v8 = vor.u32 %v380_v44, %v379_v46  ;;  %v383_v0 = vrot.slane %v379_v46, 4  ;;  %v2242_v21 = vpop.permute.xlu1 %2241 }
  0x8f   :  { %v2598_v14 = vsel %vm262_vm7, %v2409_v42, %v2224_v2  ;;  %v2602_v18 = vsel %vm262_vm7, %v2404_v41, %v2223_v55  ;;  %v283_v17 = vsel %vm279_vm8, %v266_v52, %v2218_v61  ;;  %v291_v16 = vsel %vm279_vm8, %v274_v49, %v2219_v60  ;;  %v2237_v44 = vpop.permute.xlu0 %2236  ;;  %v540_v49 = vld [vmem:[#allocation2 + $0x20] sm:$0xf]  ;;  %v588_v2 = vld [vmem:[#allocation2 + $0x70] sm:$0xf]  ;;  %v591_v55 = vld [vmem:[#allocation2 + $0x74] sm:$0x1] }
  0x90   :  { %v529_v59 = vsel %vm2374_vm6, %v374_v63, %v528_v40  ;;  %v532_v1 = vsel %vm2335_vm4, %v375_v7, %v531_v53  ;;  %v535_v6 = vsel %vm2374_vm6, %v382_v8, %v534_v54  ;;  %v538_v42 = vsel %vm2335_vm4, %v383_v0, %v537_v56  ;;  %v543_v56 = vld [vmem:[#allocation2 + $0x24] sm:$0x1] }
  0x91   :  { %530 = vst [vmem:[#allocation2 + $0x10] sm:$0xf] %v529_v59  ;;  %533 = vst [vmem:[#allocation2 + $0x14] sm:$0x1] %v532_v1  ;;  %v2042_v41 = vpack.c.bf16 %v283_v17, %v283_v17  ;;  %v2050_v23 = vpack.c.bf16 %v291_v16, %v291_v16  ;;  %v2234_v30 = vunpack.i.h.bf16 %v2232_v45  ;;  %v2233_v5 = vunpack.i.l.bf16 %v2232_v45 }
  0x92   :  { %536 = vst [vmem:[#allocation2 + $0x18] sm:$0xf] %v535_v6  ;;  %539 = vst [vmem:[#allocation2 + $0x1c] sm:$0x1] %v538_v42  ;;  %v2229_v31 = vunpack.i.h.bf16 %v2227_v4  ;;  %v2228_v32 = vunpack.i.l.bf16 %v2227_v4  ;;  %v2244_v35 = vunpack.i.h.bf16 %v2242_v21  ;;  %v2243_v36 = vunpack.i.l.bf16 %v2242_v21 }
  0x93   :  { %v385_v15 = vshrl.u32 %v2042_v41, 16  ;;  %v388_v12 = vshll.u32 %v2042_v41, 16  ;;  %v449_v11 = vshrl.u32 %v2050_v23, 16  ;;  %v452_v37 = vshll.u32 %v2050_v23, 16  ;;  %v2247_v21 = vpop.permute.xlu0 %2246  ;;  %v546_v41 = vld [vmem:[#allocation2 + $0x28] sm:$0xf] }
  0x94   :  { %v284_v40 = vsel %vm279_vm8, %v2582_v20, %v2233_v5  ;;  %v292_v43 = vsel %vm279_vm8, %v2578_v19, %v2234_v30  ;;  %v277_v46 = vsel %vm262_vm7, %v2429_v51, %v2229_v31  ;;  %v276_v45 = vsel %vm262_vm7, %v2424_v50, %v2228_v32  ;;  %v549_v32 = vld [vmem:[#allocation2 + $0x2c] sm:$0x1] }
  0x95   :  { %v387_v52 = vrot.slane %v385_v15, 7  ;;  %v451_v4 = vrot.slane %v449_v11, 7  ;;  %v2043_v53 = vpack.c.bf16 %v284_v40, %v284_v40  ;;  %v2051_v54 = vpack.c.bf16 %v292_v43, %v292_v43 }
  0x96   :  { %v293_v60 = vsel %vm279_vm8, %v276_v45, %v2243_v36  ;;  %v294_v20 = vsel %vm279_vm8, %v277_v46, %v2244_v35  ;;  %v2239_v61 = vunpack.i.h.bf16 %v2237_v44  ;;  %v2238_v19 = vunpack.i.l.bf16 %v2237_v44  ;;  %v594_v35 = vld [vmem:[#allocation2 + $0x78] sm:$0xf]  ;;  %v597_v36 = vld [vmem:[#allocation2 + $0x7c] sm:$0x1] }
  0x97   :  { %v390_v63 = vor.u32 %v388_v12, %v387_v52  ;;  %v391_v7 = vrot.slane %v387_v52, 4  ;;  %v454_v51 = vor.u32 %v452_v37, %v451_v4  ;;  %v455_v8 = vrot.slane %v451_v4, 4 }
  0x98   :  { %v393_v0 = vshrl.u32 %v2043_v53, 16  ;;  %v396_v50 = vshll.u32 %v2043_v53, 16  ;;  %v457_v17 = vshrl.u32 %v2051_v54, 16  ;;  %v460_v16 = vshll.u32 %v2051_v54, 16  ;;  %v2252_v53 = vpop.permute.xlu1 %2251 }
  0x99   :  { %v541_v59 = vsel %vm2374_vm6, %v390_v63, %v540_v49  ;;  %v544_v1 = vsel %vm2335_vm4, %v391_v7, %v543_v56  ;;  %v589_v6 = vsel %vm2374_vm6, %v454_v51, %v588_v2  ;;  %v592_v42 = vsel %vm2335_vm4, %v455_v8, %v591_v55  ;;  %v600_v2 = vld [vmem:[#allocation2 + $0x80] sm:$0xf]  ;;  %v606_v63 = vld [vmem:[#allocation2 + $0x88] sm:$0xf]  ;;  %v609_v7 = vld [vmem:[#allocation2 + $0x8c] sm:$0x1] }
  0x9a   :  { %542 = vst [vmem:[#allocation2 + $0x20] sm:$0xf] %v541_v59  ;;  %545 = vst [vmem:[#allocation2 + $0x24] sm:$0x1] %v544_v1  ;;  %v395_v23 = vrot.slane %v393_v0, 7  ;;  %v459_v30 = vrot.slane %v457_v17, 7  ;;  %v2052_v5 = vpack.c.bf16 %v293_v60, %v293_v60  ;;  %v2053_v31 = vpack.c.bf16 %v294_v20, %v294_v20 }
  0x9b   :  { %590 = vst [vmem:[#allocation2 + $0x70] sm:$0xf] %v589_v6  ;;  %593 = vst [vmem:[#allocation2 + $0x74] sm:$0x1] %v592_v42  ;;  %v286_v44 = vsel %vm279_vm8, %v2598_v14, %v2239_v61  ;;  %v285_v15 = vsel %vm279_vm8, %v2602_v18, %v2238_v19  ;;  %v2249_v12 = vunpack.i.h.bf16 %v2247_v21  ;;  %v2248_v11 = vunpack.i.l.bf16 %v2247_v21  ;;  %v603_v19 = vld [vmem:[#allocation2 + $0x84] sm:$0x1] }
  0x9c   :  { %v398_v37 = vor.u32 %v396_v50, %v395_v23  ;;  %v399_v40 = vrot.slane %v395_v23, 4  ;;  %v462_v43 = vor.u32 %v460_v16, %v459_v30  ;;  %v463_v46 = vrot.slane %v459_v30, 4  ;;  %v618_v30 = vld [vmem:[#allocation2] ss:$8 sps:$4 sm:$0xff]  }
  0x9d   :  { %v465_v45 = vshrl.u32 %v2052_v5, 16  ;;  %v468_v49 = vshll.u32 %v2052_v5, 16  ;;  %v473_v52 = vshrl.u32 %v2053_v31, 16  ;;  %v476_v4 = vshll.u32 %v2053_v31, 16 }
  0x9e   :  { %v547_v54 = vsel %vm2374_vm6, %v398_v37, %v546_v41  ;;  %v550_v14 = vsel %vm2335_vm4, %v399_v40, %v549_v32  ;;  %v595_v18 = vsel %vm2374_vm6, %v462_v43, %v594_v35  ;;  %v598_v56 = vsel %vm2335_vm4, %v463_v46, %v597_v36 }
  0x9f   :  { %548 = vst [vmem:[#allocation2 + $0x28] sm:$0xf] %v547_v54  ;;  %551 = vst [vmem:[#allocation2 + $0x2c] sm:$0x1] %v550_v14  ;;  %v467_v55 = vrot.slane %v465_v45, 7  ;;  %v475_v60 = vrot.slane %v473_v52, 7  ;;  %v2045_v20 = vpack.c.bf16 %v286_v44, %v286_v44  ;;  %v2044_v61 = vpack.c.bf16 %v285_v15, %v285_v15 }
  0xa0   :  { %596 = vst [vmem:[#allocation2 + $0x78] sm:$0xf] %v595_v18  ;;  %599 = vst [vmem:[#allocation2 + $0x7c] sm:$0x1] %v598_v56  ;;  %v278_v51 = vsel %vm262_vm7, %v2465_v10, %v2249_v12  ;;  %v270_v8 = vsel %vm262_vm7, %v2451_v3, %v2248_v11  ;;  %v2254_v0 = vunpack.i.h.bf16 %v2252_v53  ;;  %v2253_v50 = vunpack.i.l.bf16 %v2252_v53  ;;  %v558_v15 = vld [vmem:[#allocation2 + $0x38] sm:$0xf] }
  0xa1   :  { %v470_v16 = vor.u32 %v468_v49, %v467_v55  ;;  %v471_v21 = vrot.slane %v467_v55, 4  ;;  %v478_v59 = vor.u32 %v476_v4, %v475_v60  ;;  %v479_v1 = vrot.slane %v475_v60, 4  ;;  %v561_v12 = vld [vmem:[#allocation2 + $0x3c] sm:$0x1]  ;;  %v622_v53 = vld [vmem:[#allocation2 + $0x10] ss:$8 sps:$4 sm:$0xff]  }
  0xa2   :  { %v626_v17 = vld [vmem:[#allocation2 + $0x20] ss:$80 sps:$4 sm:$0xff]   ;;  %v409_v41 = vshrl.u32 %v2045_v20, 16  ;;  %v412_v23 = vshll.u32 %v2045_v20, 16  ;;  %v401_v35 = vshrl.u32 %v2044_v61, 16  ;;  %v404_v36 = vshll.u32 %v2044_v61, 16 }
  0xa3   :  { %v2648_v6 = vunpack.c.l.bf16 %v626_v17  ;;  %v2650_v42 = vunpack.c.h.bf16 %v626_v17  ;;  %v601_v10 = vsel %vm2374_vm6, %v470_v16, %v600_v2  ;;  %v604_v3 = vsel %vm2335_vm4, %v471_v21, %v603_v19  ;;  %v552_v18 = vld [vmem:[#allocation2 + $0x30] sm:$0xf]  ;;  %v555_v56 = vld [vmem:[#allocation2 + $0x34] sm:$0x1]  ;;  %v564_v21 = vld [vmem:[#allocation2 + $0x40] sm:$0xf] }
  0xa4   :  { %v607_v5 = vsel %vm2374_vm6, %v478_v59, %v606_v63  ;;  %v610_v31 = vsel %vm2335_vm4, %v479_v1, %v609_v7  ;;  %602 = vst [vmem:[#allocation2 + $0x80] sm:$0xf] %v601_v10  ;;  %605 = vst [vmem:[#allocation2 + $0x84] sm:$0x1] %v604_v3  ;;  %v411_v32 = vrot.slane %v409_v41, 7  ;;  %v287_v44 = vsel %vm279_vm8, %v270_v8, %v2253_v50 }
  0xa5   :  { %608 = vst [vmem:[#allocation2 + $0x88] sm:$0xf] %v607_v5  ;;  %611 = vst [vmem:[#allocation2 + $0x8c] sm:$0x1] %v610_v31  ;;  %v295_v11 = vsel %vm279_vm8, %v278_v51, %v2254_v0  ;;  %v2046_v37 = vpack.c.bf16 %v287_v44, %v287_v44  ;;  %v2662_v40 = vunpack.c.l.bf16 %v618_v30  ;;  %v2664_v43 = vunpack.c.h.bf16 %v618_v30  ;;  %v2677_v63 = vld [vmem:[%s3329_s2] ss:$0 sm:$0xff] }
  0xa6   :  { %v414_v45 = vor.u32 %v412_v23, %v411_v32  ;;  %v415_v49 = vrot.slane %v411_v32, 4  ;;  %v403_v52 = vrot.slane %v401_v35, 7  ;;  %v2054_v4 = vpack.c.bf16 %v295_v11, %v295_v11  ;;  %v621_v0 = vld [vmem:[#allocation2 + $0xc] sm:$0x1]  ;;  %v567_v59 = vld [vmem:[#allocation2 + $0x44] sm:$0x1] }
  0xa7   :  { %v628_v46 = vld [vmem:[#allocation2 + $0x28] ss:$80 sps:$4 sm:$0xff]   ;;  %v417_v2 = vshrl.u32 %v2046_v37, 16  ;;  %v420_v55 = vshll.u32 %v2046_v37, 16  ;;  %v2679_v50 = vunpack.c.l.bf16 %v622_v53  ;;  %v623_v1 = vld [vmem:[#allocation2 + $0x14] sm:$0x1]  ;;  %v2685_v41 = vunpack.c.h.bf16 %v622_v53 }
  0xa8   :  { %v2666_v54 = vunpack.c.l.bf16 %v628_v46  ;;  %v2668_v14 = vunpack.c.h.bf16 %v628_v46  ;;  %v559_v60 = vsel %vm2374_vm6, %v414_v45, %v558_v15  ;;  %v562_v20 = vsel %vm2335_vm4, %v415_v49, %v561_v12  ;;  %v625_v31 = vld [vmem:[#allocation2 + $0x1c] sm:$0x1]  ;;  %v612_v44 = vld [vmem:[#allocation2 + $0x90] sm:$0xf]  ;;  %v615_v15 = vld [vmem:[#allocation2 + $0x94] sm:$0x1] }
  0xa9   :  { %v406_v61 = vor.u32 %v404_v36, %v403_v52  ;;  %v407_v19 = vrot.slane %v403_v52, 4  ;;  %560 = vst [vmem:[#allocation2 + $0x38] sm:$0xf] %v559_v60  ;;  %563 = vst [vmem:[#allocation2 + $0x3c] sm:$0x1] %v562_v20  ;;  %v419_v7 = vrot.slane %v417_v2, 7  ;;  %v687_v23 = vmul.f32 %v2528_v24, %v2662_v40 }
  0xaa   :  { %v481_v51 = vshrl.u32 %v2054_v4, 16  ;;  %v484_v8 = vshll.u32 %v2054_v4, 16  ;;  %v688_v32 = vmul.f32 %v2528_v24, %v2664_v43  ;;  %v720_v11 = vunpack.c.l.bf16 %v621_v0 }
  0xab   :  { %v553_v17 = vsel %vm2374_vm6, %v406_v61, %v552_v18  ;;  %v556_v16 = vsel %vm2335_vm4, %v407_v19, %v555_v56  ;;  %v422_v10 = vor.u32 %v420_v55, %v419_v7  ;;  %v423_v3 = vrot.slane %v419_v7, 4 }
  0xac   :  { %v650_v30 = vld [vmem:[#allocation2 + $0x80] ss:$8 sps:$4 sm:$0xff]   ;;  %554 = vst [vmem:[#allocation2 + $0x30] sm:$0xf] %v553_v17  ;;  %557 = vst [vmem:[#allocation2 + $0x34] sm:$0x1] %v556_v16  ;;  %v703_v12 = vadd.f32 %v2677_v63, %v687_v23  ;;  %v704_v52 = vadd.f32 %v2677_v63, %v688_v32  ;;  %v2701_v4 = vunpack.c.l.bf16 %v623_v1  ;;  %v2703_v53 = vunpack.c.l.bf16 %v625_v31 }
  0xad   :  { %v483_v5 = vrot.slane %v481_v51, 7  ;;  %v2691_v35 = vunpack.c.l.bf16 %v650_v30  ;;  %v2693_v36 = vunpack.c.h.bf16 %v650_v30  ;;  %v565_v45 = vsel %vm2374_vm6, %v422_v10, %v564_v21 }
  0xae   :  { %v568_v49 = vsel %vm2335_vm4, %v423_v3, %v567_v59  ;;  %566 = vst [vmem:[#allocation2 + $0x40] sm:$0xf] %v565_v45  ;;  %v739_v18 = vmul.f32 %v2518_v57, %v2662_v40  ;;  %v741_v55 = vmul.f32 %v2518_v57, %v2664_v43  ;;  %v742_v60 = vmul.f32 %v2518_v57, %v720_v11 }
  0xaf   :  { %v486_v37 = vor.u32 %v484_v8, %v483_v5  ;;  %v487_v46 = vrot.slane %v483_v5, 4  ;;  %569 = vst [vmem:[#allocation2 + $0x44] sm:$0x1] %v568_v49  ;;  %v888_v19 = vmul.f32 %v2520_v58, %v2662_v40  ;;  %v890_v7 = vmul.f32 %v2520_v58, %v2664_v43 }
  0xb0   :  { %v632_v20 = vld [vmem:[#allocation2 + $0x38] sm:$0xf]  ;;  %v804_v61 = vrot.slane %v739_v18, 1  ;;  %v891_v22 = vmul.f32 %v2520_v58, %v720_v11  ;;  %v807_v9 = vrot.slane %v741_v55, 1  ;;  %v808_v8 = vrot.slane %v742_v60, 1 }
  0xb1   :  { %v613_v56 = vsel %vm2374_vm6, %v486_v37, %v612_v44  ;;  %v616_v2 = vsel %vm2335_vm4, %v487_v46, %v615_v15  ;;  %v2719_v51 = vunpack.c.l.bf16 %v632_v20  ;;  %v1039_v0 = vmul.f32 %v2530_v25, %v2664_v43 }
  0xb2   :  { %614 = vst [vmem:[#allocation2 + $0x90] sm:$0xf] %v613_v56  ;;  %617 = vst [vmem:[#allocation2 + $0x94] sm:$0x1] %v616_v2  ;;  %v806_v16 = vsel %vm803_vm9, %v804_v61, %v805_v26  ;;  %v953_v21 = vrot.slane %v888_v19, 2  ;;  %v956_v59 = vrot.slane %v890_v7, 2  ;;  %v809_v23 = vsel %vm803_vm9, %v807_v9, %v808_v8 }
  0xb3   :  { %v630_v17 = vld [vmem:[#allocation2 + $0x30] sm:$0xf]  ;;  %v957_v40 = vrot.slane %v891_v22, 2  ;;  %v868_v30 = vadd.f32 %v806_v16, %v703_v12  ;;  %v1040_v10 = vmul.f32 %v2530_v25, %v2679_v50  ;;  %v869_v3 = vadd.f32 %v809_v23, %v704_v52 }
  0xb4   :  { %v2726_v1 = vunpack.c.l.bf16 %v630_v17  ;;  %v955_v5 = vsel %vm952_vm10, %v953_v21, %v954_v33  ;;  %v1077_v26 = vmul.f32 %v2533_v27, %v2664_v43  ;;  %v1078_v32 = vmul.f32 %v2533_v27, %v720_v11 }
  0xb5   :  { %v958_v62 = vsel %vm952_vm10, %v956_v59, %v957_v40  ;;  %v1017_v31 = vadd.f32 %v955_v5, %v868_v30  ;;  %v1079_v44 = vmul.f32 %v2533_v27, %v2679_v50  ;;  %v1080_v15 = vmul.f32 %v2533_v27, %v2701_v4 }
  0xb6   :  { %v1018_v12 = vadd.f32 %v958_v62, %v869_v3  ;;  %v1141_v37 = vrot.slane %v1077_v26, 1  ;;  %v1225_v13 = vmul.f32 %v2542_v34, %v2664_v43  ;;  %v1226_v33 = vmul.f32 %v2542_v34, %v720_v11  ;;  %v2756_v11 = vld [vmem:[%s3328_s1 + $0x8] ss:$0 sm:$0xff] }
  0xb7   :  { %v1055_v46 = vadd.f32 %v1039_v0, %v1017_v31  ;;  %v1142_v45 = vrot.slane %v1078_v32, 1  ;;  %v1144_v49 = vrot.slane %v1079_v44, 1  ;;  %v1145_v52 = vrot.slane %v1080_v15, 1  ;;  %v638_v44 = vld [vmem:[#allocation2 + $0x50] ss:$8 sps:$4 sm:$0xff]  }
  0xb8   :  { %v1056_v18 = vadd.f32 %v1040_v10, %v1018_v12  ;;  %v1227_v56 = vmul.f32 %v2542_v34, %v2679_v50  ;;  %v1228_v2 = vmul.f32 %v2542_v34, %v2701_v4  ;;  %v1289_v55 = vrot.slane %v1225_v13, 2 }
  0xb9   :  { %v1143_v60 = vsel %vm803_vm9, %v1141_v37, %v1142_v45  ;;  %v1146_v20 = vsel %vm803_vm9, %v1144_v49, %v1145_v52  ;;  %v1290_v61 = vrot.slane %v1226_v33, 2  ;;  %v1375_v43 = vmul.f32 %v2544_v38, %v2679_v50  ;;  %v642_v33 = vld [vmem:[#allocation2 + $0x60] ss:$8 sps:$4 sm:$0xff]  }
  0xba   :  { %v1205_v19 = vadd.f32 %v1143_v60, %v1055_v46  ;;  %v1206_v7 = vadd.f32 %v1146_v20, %v1056_v18  ;;  %v1292_v22 = vrot.slane %v1227_v56, 2  ;;  %v1293_v9 = vrot.slane %v1228_v2, 2  ;;  %v641_v18 = vld [vmem:[#allocation2 + $0x5c] sm:$0x1]  ;;  %v643_v60 = vld [vmem:[#allocation2 + $0x64] sm:$0x1] }
  0xbb   :  { %v1291_v8 = vsel %vm952_vm10, %v1289_v55, %v1290_v61  ;;  %v1376_v0 = vmul.f32 %v2544_v38, %v2685_v41  ;;  %v1413_v17 = vmul.f32 %v2546_v39, %v2679_v50  ;;  %v1414_v16 = vmul.f32 %v2546_v39, %v2701_v4  ;;  %v645_v20 = vld [vmem:[#allocation2 + $0x6c] sm:$0x1] }
  0xbc   :  { %v1294_v21 = vsel %vm952_vm10, %v1292_v22, %v1293_v9  ;;  %v1353_v59 = vadd.f32 %v1291_v8, %v1205_v19  ;;  %v1415_v40 = vmul.f32 %v2546_v39, %v2685_v41  ;;  %v1416_v23 = vmul.f32 %v2546_v39, %v2703_v53 }
  0xbd   :  { %v1354_v30 = vadd.f32 %v1294_v21, %v1206_v7  ;;  %v1477_v10 = vrot.slane %v1413_v17, 1  ;;  %v1478_v3 = vrot.slane %v1414_v16, 1  ;;  %v1561_v5 = vmul.f32 %v2756_v11, %v2679_v50 }
  0xbe   :  { %v1391_v62 = vadd.f32 %v1375_v43, %v1353_v59  ;;  %v1480_v26 = vrot.slane %v1415_v40, 1  ;;  %v1481_v31 = vrot.slane %v1416_v23, 1  ;;  %v1562_v32 = vmul.f32 %v2756_v11, %v2701_v4 }
  0xbf   :  { %v1392_v15 = vadd.f32 %v1376_v0, %v1354_v30  ;;  %v1479_v12 = vsel %vm803_vm9, %v1477_v10, %v1478_v3  ;;  %v1563_v37 = vmul.f32 %v2756_v11, %v2685_v41  ;;  %v1564_v13 = vmul.f32 %v2756_v11, %v2703_v53 }
  0xc0   :  { %v1482_v46 = vsel %vm803_vm9, %v1480_v26, %v1481_v31  ;;  %v1541_v45 = vadd.f32 %v1479_v12, %v1391_v62  ;;  %v1625_v49 = vrot.slane %v1561_v5, 2  ;;  %v1626_v52 = vrot.slane %v1562_v32, 2 }
  0xc1   :  { %v1542_v56 = vadd.f32 %v1482_v46, %v1392_v15  ;;  %v1628_v2 = vrot.slane %v1563_v37, 2  ;;  %v1629_v55 = vrot.slane %v1564_v13, 2  ;;  %v675_v61 = vunpack.c.l.bf16 %v638_v44 }
  0xc2   :  { %v1627_v43 = vsel %vm952_vm10, %v1625_v49, %v1626_v52  ;;  %v676_v19 = vunpack.c.h.bf16 %v638_v44  ;;  %v2781_v7 = vunpack.c.l.bf16 %v642_v33  ;;  %v2783_v22 = vunpack.c.h.bf16 %v642_v33 }
  0xc3   :  { %v1630_v9 = vsel %vm952_vm10, %v1628_v2, %v1629_v55  ;;  %v1689_v8 = vadd.f32 %v1627_v43, %v1541_v45  ;;  %v695_v0 = vmul.f32 %v2528_v24, %v675_v61  ;;  %v728_v17 = vunpack.c.l.bf16 %v641_v18 }
  0xc4   :  { %v1690_v16 = vadd.f32 %v1630_v9, %v1542_v56  ;;  %v696_v21 = vmul.f32 %v2528_v24, %v676_v19  ;;  %v2788_v59 = vunpack.c.l.bf16 %v643_v60  ;;  %v2790_v40 = vunpack.c.l.bf16 %v645_v20 }
  0xc5   :  { %v1705_v23 = vmax.f32 %v1689_v8, 0.0  ;;  %v711_v30 = vadd.f32 %v2677_v63, %v695_v0  ;;  %v755_v10 = vmul.f32 %v2518_v57, %v675_v61  ;;  %v757_v3 = vmul.f32 %v2518_v57, %v676_v19 }
  0xc6   :  { %v1706_v5 = vmax.f32 %v1690_v16, 0.0  ;;  %v712_v62 = vadd.f32 %v2677_v63, %v696_v21  ;;  %v758_v26 = vmul.f32 %v2518_v57, %v728_v17  ;;  %v904_v31 = vmul.f32 %v2520_v58, %v675_v61 }
  0xc7   :  { %v828_v32 = vrot.slane %v755_v10, 1  ;;  %v831_v44 = vrot.slane %v757_v3, 1  ;;  %v906_v15 = vmul.f32 %v2520_v58, %v676_v19  ;;  %v907_v12 = vmul.f32 %v2520_v58, %v728_v17 }
  0xc8   :  { %v1721_v37 = vpack.c.bf16 %v1706_v5, %v1705_v23  ;;  %v832_v13 = vrot.slane %v758_v26, 1  ;;  %v977_v33 = vrot.slane %v904_v31, 2  ;;  %v1047_v46 = vmul.f32 %v2530_v25, %v676_v19 }
  0xc9   :  { %v830_v45 = vsel %vm803_vm9, %v828_v32, %v829_v47  ;;  %v980_v49 = vrot.slane %v906_v15, 2  ;;  %v981_v52 = vrot.slane %v907_v12, 2  ;;  %v1048_v18 = vmul.f32 %v2530_v25, %v2781_v7 }
  0xca   :  { %2144 = vmatprep.mubr.msk.bf16.mxu0 %vm1784_vm11, %v1721_v37  ;;  %v833_v56 = vsel %vm803_vm9, %v831_v44, %v832_v13  ;;  %v876_v2 = vadd.f32 %v830_v45, %v711_v30  ;;  %v979_v55 = vsel %vm952_vm10, %v977_v33, %v978_v48  ;;  %v1093_v60 = vmul.f32 %v2533_v27, %v676_v19 }
  0xcb   :  { %v877_v20 = vadd.f32 %v833_v56, %v712_v62  ;;  %v982_v28 = vsel %vm952_vm10, %v980_v49, %v981_v52  ;;  %v1094_v47 = vmul.f32 %v2533_v27, %v728_v17  ;;  %v1095_v61 = vmul.f32 %v2533_v27, %v2781_v7 }
  0xcc   :  { %v1025_v43 = vadd.f32 %v979_v55, %v876_v2  ;;  %v1096_v9 = vmul.f32 %v2533_v27, %v2788_v59  ;;  %v1165_v8 = vrot.slane %v1093_v60, 1  ;;  %v1241_v0 = vmul.f32 %v2542_v34, %v676_v19 }
  0xcd   :  { %v1026_v29 = vadd.f32 %v982_v28, %v877_v20  ;;  %v1166_v16 = vrot.slane %v1094_v47, 1  ;;  %v1168_v48 = vrot.slane %v1095_v61, 1  ;;  %v1242_v21 = vmul.f32 %v2542_v34, %v728_v17 }
  0xce   :  { %v1063_v23 = vadd.f32 %v1047_v46, %v1025_v43  ;;  %v1169_v30 = vrot.slane %v1096_v9, 1  ;;  %v1243_v10 = vmul.f32 %v2542_v34, %v2781_v7  ;;  %v1244_v3 = vmul.f32 %v2542_v34, %v2788_v59 }
  0xcf   :  { %v1064_v5 = vadd.f32 %v1048_v18, %v1026_v29  ;;  %v1167_v62 = vsel %vm803_vm9, %v1165_v8, %v1166_v16  ;;  %v1313_v26 = vrot.slane %v1241_v0, 2  ;;  %v1314_v31 = vrot.slane %v1242_v21, 2  ;;  %v629_v21 = vld [vmem:[#allocation2 + $0x2c] sm:$0x1] }
  0xd0   :  { %v1170_v19 = vsel %vm803_vm9, %v1168_v48, %v1169_v30  ;;  %v1213_v32 = vadd.f32 %v1167_v62, %v1063_v23  ;;  %v1316_v44 = vrot.slane %v1243_v10, 2  ;;  %v1317_v15 = vrot.slane %v1244_v3, 2  ;;  %v627_v48 = vld [vmem:[#allocation2 + $0x24] sm:$0x1] }
  0xd1   :  { %v1214_v12 = vadd.f32 %v1170_v19, %v1064_v5  ;;  %v1315_v17 = vsel %vm952_vm10, %v1313_v26, %v1314_v31  ;;  %v1383_v37 = vmul.f32 %v2544_v38, %v2781_v7  ;;  %v1384_v13 = vmul.f32 %v2544_v38, %v2783_v22 }
  0xd2   :  { %v1318_v33 = vsel %vm952_vm10, %v1316_v44, %v1317_v15  ;;  %v1361_v46 = vadd.f32 %v1315_v17, %v1213_v32  ;;  %v1429_v45 = vmul.f32 %v2546_v39, %v2781_v7  ;;  %v1430_v49 = vmul.f32 %v2546_v39, %v2788_v59 }
  0xd3   :  { %v1362_v52 = vadd.f32 %v1318_v33, %v1214_v12  ;;  %v1431_v18 = vmul.f32 %v2546_v39, %v2783_v22  ;;  %v1432_v56 = vmul.f32 %v2546_v39, %v2790_v40  ;;  %v1577_v2 = vmul.f32 %v2756_v11, %v2781_v7 }
  0xd4   :  { %v1399_v55 = vadd.f32 %v1383_v37, %v1361_v46  ;;  %v1501_v60 = vrot.slane %v1429_v45, 1  ;;  %v1502_v20 = vrot.slane %v1430_v49, 1  ;;  %v1578_v28 = vmul.f32 %v2756_v11, %v2788_v59 }
  0xd5   :  { %v1400_v47 = vadd.f32 %v1384_v13, %v1362_v52  ;;  %v1504_v61 = vrot.slane %v1431_v18, 1  ;;  %v1505_v43 = vrot.slane %v1432_v56, 1  ;;  %v1579_v9 = vmul.f32 %v2756_v11, %v2783_v22 }
  0xd6   :  { %v1503_v8 = vsel %vm803_vm9, %v1501_v60, %v1502_v20  ;;  %v1580_v0 = vmul.f32 %v2756_v11, %v2790_v40  ;;  %v1649_v29 = vrot.slane %v1577_v2, 2  ;;  %v1650_v16 = vrot.slane %v1578_v28, 2 }
  0xd7   :  { %v1506_v23 = vsel %vm803_vm9, %v1504_v61, %v1505_v43  ;;  %v1549_v30 = vadd.f32 %v1503_v8, %v1399_v55  ;;  %v1652_v10 = vrot.slane %v1579_v9, 2  ;;  %v689_v3 = vmul.f32 %v2528_v24, %v2679_v50 }
  0xd8   :  { %v1550_v5 = vadd.f32 %v1506_v23, %v1400_v47  ;;  %v1651_v62 = vsel %vm952_vm10, %v1649_v29, %v1650_v16  ;;  %v1653_v26 = vrot.slane %v1580_v0, 2  ;;  %v690_v31 = vmul.f32 %v2528_v24, %v2685_v41 }
  0xd9   :  { %v1697_v19 = vadd.f32 %v1651_v62, %v1549_v30  ;;  %v705_v32 = vadd.f32 %v2677_v63, %v689_v3  ;;  %v2856_v44 = vunpack.c.l.bf16 %v627_v48  ;;  %v2858_v15 = vunpack.c.l.bf16 %v629_v21 }
  0xda   :  { %v1654_v12 = vsel %vm952_vm10, %v1652_v10, %v1653_v26  ;;  %v706_v17 = vadd.f32 %v2677_v63, %v690_v31  ;;  %v743_v37 = vmul.f32 %v2518_v57, %v2679_v50  ;;  %v744_v13 = vmul.f32 %v2518_v57, %v2701_v4 }
  0xdb   :  { %v1698_v33 = vadd.f32 %v1654_v12, %v1550_v5  ;;  %v1713_v46 = vmax.f32 %v1697_v19, 0.0  ;;  %v745_v45 = vmul.f32 %v2518_v57, %v2685_v41  ;;  %v746_v49 = vmul.f32 %v2518_v57, %v2703_v53 }
  0xdc   :  { %v810_v52 = vrot.slane %v743_v37, 1  ;;  %v811_v18 = vrot.slane %v744_v13, 1  ;;  %v892_v56 = vmul.f32 %v2520_v58, %v2679_v50  ;;  %v893_v2 = vmul.f32 %v2520_v58, %v2701_v4 }
  0xdd   :  { %v1714_v55 = vmax.f32 %v1698_v33, 0.0  ;;  %v813_v60 = vrot.slane %v745_v45, 1  ;;  %v814_v20 = vrot.slane %v746_v49, 1  ;;  %v894_v28 = vmul.f32 %v2520_v58, %v2685_v41 }
  0xde   :  { %v812_v47 = vsel %vm803_vm9, %v810_v52, %v811_v18  ;;  %v895_v61 = vmul.f32 %v2520_v58, %v2703_v53  ;;  %v959_v43 = vrot.slane %v892_v56, 2  ;;  %v960_v9 = vrot.slane %v893_v2, 2 }
  0xdf   :  { %v1725_v8 = vpack.c.bf16 %v1714_v55, %v1713_v46  ;;  %v815_v0 = vsel %vm803_vm9, %v813_v60, %v814_v20  ;;  %v870_v50 = vadd.f32 %v812_v47, %v705_v32  ;;  %v962_v29 = vrot.slane %v894_v28, 2 }
  0xe0   :  { %v871_v16 = vadd.f32 %v815_v0, %v706_v17  ;;  %v961_v4 = vsel %vm952_vm10, %v959_v43, %v960_v9  ;;  %v963_v48 = vrot.slane %v895_v61, 2  ;;  %v1041_v21 = vmul.f32 %v2530_v25, %v2685_v41 }
  0xe1   :  { %2152 = vmatprep.mubr.msk.bf16.mxu1 %vm1784_vm11, %v1725_v8  ;;  %v1019_v23 = vadd.f32 %v961_v4, %v870_v50  ;;  %v1042_v30 = vmul.f32 %v2530_v25, %v2648_v6  ;;  %v1081_v10 = vmul.f32 %v2533_v27, %v2685_v41  ;;  %v1082_v3 = vmul.f32 %v2533_v27, %v2703_v53 }
  0xe2   :  { %v964_v5 = vsel %vm952_vm10, %v962_v29, %v963_v48  ;;  %v1083_v62 = vmul.f32 %v2533_v27, %v2648_v6  ;;  %v1084_v26 = vmul.f32 %v2533_v27, %v2856_v44  ;;  %v1229_v31 = vmul.f32 %v2542_v34, %v2685_v41 }
  0xe3   :  { %v1020_v19 = vadd.f32 %v964_v5, %v871_v16  ;;  %v1057_v32 = vadd.f32 %v1041_v21, %v1019_v23  ;;  %v1147_v12 = vrot.slane %v1081_v10, 1  ;;  %v1148_v17 = vrot.slane %v1082_v3, 1 }
  0xe4   :  { %v1150_v37 = vrot.slane %v1083_v62, 1  ;;  %v1151_v13 = vrot.slane %v1084_v26, 1  ;;  %v1230_v33 = vmul.f32 %v2542_v34, %v2703_v53  ;;  %v1231_v46 = vmul.f32 %v2542_v34, %v2648_v6 }
  0xe5   :  { %v1058_v45 = vadd.f32 %v1042_v30, %v1020_v19  ;;  %v1149_v49 = vsel %vm803_vm9, %v1147_v12, %v1148_v17  ;;  %v1232_v52 = vmul.f32 %v2542_v34, %v2856_v44  ;;  %v1295_v18 = vrot.slane %v1229_v31, 2  ;;  %v647_v19 = vld [vmem:[#allocation2 + $0x74] sm:$0x1] }
  0xe6   :  { %v1152_v41 = vsel %vm803_vm9, %v1150_v37, %v1151_v13  ;;  %v1207_v56 = vadd.f32 %v1149_v49, %v1057_v32  ;;  %v1296_v2 = vrot.slane %v1230_v33, 2  ;;  %v1298_v55 = vrot.slane %v1231_v46, 2  ;;  %v649_v32 = vld [vmem:[#allocation2 + $0x7c] sm:$0x1] }
  0xe7   :  { %v1208_v60 = vadd.f32 %v1152_v41, %v1058_v45  ;;  %v1299_v20 = vrot.slane %v1232_v52, 2  ;;  %v1377_v53 = vmul.f32 %v2544_v38, %v2648_v6  ;;  %v1378_v28 = vmul.f32 %v2544_v38, %v2666_v54 }
  0xe8   :  { %v1297_v47 = vsel %vm952_vm10, %v1295_v18, %v1296_v2  ;;  %v1417_v61 = vmul.f32 %v2546_v39, %v2648_v6  ;;  %v1418_v43 = vmul.f32 %v2546_v39, %v2856_v44  ;;  %v1419_v9 = vmul.f32 %v2546_v39, %v2666_v54 }
  0xe9   :  { %v1300_v8 = vsel %vm952_vm10, %v1298_v55, %v1299_v20  ;;  %v1355_v0 = vadd.f32 %v1297_v47, %v1207_v56  ;;  %v1420_v50 = vmul.f32 %v2546_v39, %v2858_v15  ;;  %v1565_v29 = vmul.f32 %v2756_v11, %v2648_v6 }
  0xea   :  { %v1356_v16 = vadd.f32 %v1300_v8, %v1208_v60  ;;  %v1483_v4 = vrot.slane %v1417_v61, 1  ;;  %v1484_v48 = vrot.slane %v1418_v43, 1  ;;  %v1486_v21 = vrot.slane %v1419_v9, 1 }
  0xeb   :  { %v1393_v23 = vadd.f32 %v1377_v53, %v1355_v0  ;;  %v1487_v30 = vrot.slane %v1420_v50, 1  ;;  %v1566_v10 = vmul.f32 %v2756_v11, %v2856_v44  ;;  %v1567_v3 = vmul.f32 %v2756_v11, %v2666_v54 }
  0xec   :  { %v1394_v5 = vadd.f32 %v1378_v28, %v1356_v16  ;;  %v1485_v62 = vsel %vm803_vm9, %v1483_v4, %v1484_v48  ;;  %v1568_v26 = vmul.f32 %v2756_v11, %v2858_v15  ;;  %v1631_v31 = vrot.slane %v1565_v29, 2 }
  0xed   :  { %v1488_v12 = vsel %vm803_vm9, %v1486_v21, %v1487_v30  ;;  %v1543_v17 = vadd.f32 %v1485_v62, %v1393_v23  ;;  %v1632_v37 = vrot.slane %v1566_v10, 2  ;;  %v1634_v13 = vrot.slane %v1567_v3, 2 }
  0xee   :  { %v1544_v33 = vadd.f32 %v1488_v12, %v1394_v5  ;;  %v1635_v46 = vrot.slane %v1568_v26, 2  ;;  %v697_v45 = vmul.f32 %v2528_v24, %v2781_v7  ;;  %v698_v49 = vmul.f32 %v2528_v24, %v2783_v22 }
  0xef   :  { %v1633_v52 = vsel %vm952_vm10, %v1631_v31, %v1632_v37  ;;  %v2934_v18 = vunpack.c.l.bf16 %v647_v19  ;;  %v2936_v41 = vunpack.c.l.bf16 %v649_v32  ;;  %v759_v56 = vmul.f32 %v2518_v57, %v2781_v7 }
  0xf0   :  { %v1636_v2 = vsel %vm952_vm10, %v1634_v13, %v1635_v46  ;;  %v1691_v55 = vadd.f32 %v1633_v52, %v1543_v17  ;;  %v713_v60 = vadd.f32 %v2677_v63, %v697_v45  ;;  %v714_v20 = vadd.f32 %v2677_v63, %v698_v49 }
  0xf1   :  { %v1692_v53 = vadd.f32 %v1636_v2, %v1544_v33  ;;  %v760_v28 = vmul.f32 %v2518_v57, %v2788_v59  ;;  %v761_v47 = vmul.f32 %v2518_v57, %v2783_v22  ;;  %v762_v61 = vmul.f32 %v2518_v57, %v2790_v40 }
  0xf2   :  { %v1707_v43 = vmax.f32 %v1691_v55, 0.0  ;;  %v834_v9 = vrot.slane %v759_v56, 1  ;;  %v908_v8 = vmul.f32 %v2520_v58, %v2781_v7  ;;  %v909_v0 = vmul.f32 %v2520_v58, %v2788_v59 }
  0xf3   :  { %v1708_v50 = vmax.f32 %v1692_v53, 0.0  ;;  %v835_v29 = vrot.slane %v760_v28, 1  ;;  %v837_v16 = vrot.slane %v761_v47, 1  ;;  %v838_v4 = vrot.slane %v762_v61, 1 }
  0xf4   :  { %v910_v48 = vmul.f32 %v2520_v58, %v2783_v22  ;;  %v911_v21 = vmul.f32 %v2520_v58, %v2790_v40  ;;  %v983_v23 = vrot.slane %v908_v8, 2  ;;  %v984_v30 = vrot.slane %v909_v0, 2 }
  0xf5   :  { %v1722_v10 = vpack.c.bf16 %v1708_v50, %v1707_v43  ;;  %v836_v3 = vsel %vm803_vm9, %v834_v9, %v835_v29  ;;  %v839_v7 = vsel %vm803_vm9, %v837_v16, %v838_v4  ;;  %v1049_v59 = vmul.f32 %v2530_v25, %v2783_v22 }
  0xf6   :  { %v878_v5 = vadd.f32 %v836_v3, %v713_v60  ;;  %v879_v62 = vadd.f32 %v839_v7, %v714_v20  ;;  %v985_v26 = vsel %vm952_vm10, %v983_v23, %v984_v30  ;;  %v986_v31 = vrot.slane %v910_v48, 2 }
  0xf7   :  { %2145 = vmatmul.mubr.msk.bf16.vlgmr.msra.gmra.mrb[0].mxu0 %vm1784_vm11, %v1722_v10  ;;  %v987_v19 = vrot.slane %v911_v21, 2  ;;  %v1050_v32 = vmul.f32 %v2530_v25, %v2650_v42  ;;  %v1097_v12 = vmul.f32 %v2533_v27, %v2783_v22  ;;  %v1098_v17 = vmul.f32 %v2533_v27, %v2790_v40 }
  0xf8   :  { %v1027_v37 = vadd.f32 %v985_v26, %v878_v5  ;;  %v1099_v13 = vmul.f32 %v2533_v27, %v2650_v42  ;;  %v1100_v33 = vmul.f32 %v2533_v27, %v2934_v18  ;;  %v1245_v46 = vmul.f32 %v2542_v34, %v2783_v22 }
  0xf9   :  { %v988_v45 = vsel %vm952_vm10, %v986_v31, %v987_v19  ;;  %v1171_v49 = vrot.slane %v1097_v12, 1  ;;  %v1172_v52 = vrot.slane %v1098_v17, 1  ;;  %v1246_v56 = vmul.f32 %v2542_v34, %v2790_v40 }
  0xfa   :  { %v1028_v2 = vadd.f32 %v988_v45, %v879_v62  ;;  %v1065_v55 = vadd.f32 %v1049_v59, %v1027_v37  ;;  %v1174_v60 = vrot.slane %v1099_v13, 1  ;;  %v1175_v20 = vrot.slane %v1100_v33, 1  ;;  %v631_v33 = vld [vmem:[#allocation2 + $0x34] sm:$0x1] }
  0xfb   :  { %v1173_v53 = vsel %vm803_vm9, %v1171_v49, %v1172_v52  ;;  %v1247_v28 = vmul.f32 %v2542_v34, %v2650_v42  ;;  %v1248_v47 = vmul.f32 %v2542_v34, %v2934_v18  ;;  %v1319_v22 = vrot.slane %v1245_v46, 2  ;;  %v633_v46 = vld [vmem:[#allocation2 + $0x3c] sm:$0x1] }
  0xfc   :  { %v1066_v61 = vadd.f32 %v1050_v32, %v1028_v2  ;;  %v1176_v43 = vsel %vm803_vm9, %v1174_v60, %v1175_v20  ;;  %v1215_v9 = vadd.f32 %v1173_v53, %v1065_v55  ;;  %v1320_v8 = vrot.slane %v1246_v56, 2 }
  0xfd   :  { %v1322_v0 = vrot.slane %v1247_v28, 2  ;;  %v1323_v40 = vrot.slane %v1248_v47, 2  ;;  %v1385_v50 = vmul.f32 %v2544_v38, %v2650_v42  ;;  %v1386_v29 = vmul.f32 %v2544_v38, %v2668_v14 }
  0xfe   :  { %v1216_v16 = vadd.f32 %v1176_v43, %v1066_v61  ;;  %v1321_v4 = vsel %vm952_vm10, %v1319_v22, %v1320_v8  ;;  %v1433_v48 = vmul.f32 %v2546_v39, %v2650_v42  ;;  %v1434_v21 = vmul.f32 %v2546_v39, %v2934_v18 }
  0xff   :  { %v1324_v23 = vsel %vm952_vm10, %v1322_v0, %v1323_v40  ;;  %v1363_v30 = vadd.f32 %v1321_v4, %v1215_v9  ;;  %v1435_v10 = vmul.f32 %v2546_v39, %v2668_v14  ;;  %v1436_v3 = vmul.f32 %v2546_v39, %v2936_v41 }
 0x100   :  { %v1364_v7 = vadd.f32 %v1324_v23, %v1216_v16  ;;  %v1507_v59 = vrot.slane %v1433_v48, 1  ;;  %v1508_v5 = vrot.slane %v1434_v21, 1  ;;  %v1581_v62 = vmul.f32 %v2756_v11, %v2650_v42 }
 0x101   :  { %v1401_v26 = vadd.f32 %v1385_v50, %v1363_v30  ;;  %v1510_v31 = vrot.slane %v1435_v10, 1  ;;  %v1511_v19 = vrot.slane %v1436_v3, 1  ;;  %v1582_v32 = vmul.f32 %v2756_v11, %v2934_v18 }
 0x102   :  { %v1402_v12 = vadd.f32 %v1386_v29, %v1364_v7  ;;  %v1509_v17 = vsel %vm803_vm9, %v1507_v59, %v1508_v5  ;;  %v1583_v37 = vmul.f32 %v2756_v11, %v2668_v14  ;;  %v1584_v13 = vmul.f32 %v2756_v11, %v2936_v41 }
 0x103   :  { %v1512_v45 = vsel %vm803_vm9, %v1510_v31, %v1511_v19  ;;  %v1551_v49 = vadd.f32 %v1509_v17, %v1401_v26  ;;  %v1655_v52 = vrot.slane %v1581_v62, 2  ;;  %v1656_v56 = vrot.slane %v1582_v32, 2 }
 0x104   :  { %v1552_v2 = vadd.f32 %v1512_v45, %v1402_v12  ;;  %v1658_v55 = vrot.slane %v1583_v37, 2  ;;  %v1659_v60 = vrot.slane %v1584_v13, 2  ;;  %v691_v20 = vmul.f32 %v2528_v24, %v2648_v6 }
 0x105   :  { %v1657_v53 = vsel %vm952_vm10, %v1655_v52, %v1656_v56  ;;  %v692_v28 = vmul.f32 %v2528_v24, %v2666_v54  ;;  %v3013_v47 = vunpack.c.l.bf16 %v631_v33  ;;  %v3015_v22 = vunpack.c.l.bf16 %v633_v46 }
 0x106   :  { %v1660_v61 = vsel %vm952_vm10, %v1658_v55, %v1659_v60  ;;  %v1699_v43 = vadd.f32 %v1657_v53, %v1551_v49  ;;  %v707_v9 = vadd.f32 %v2677_v63, %v691_v20  ;;  %v747_v8 = vmul.f32 %v2518_v57, %v2648_v6 }
 0x107   :  { %v1700_v0 = vadd.f32 %v1660_v61, %v1552_v2  ;;  %v708_v40 = vadd.f32 %v2677_v63, %v692_v28  ;;  %v748_v50 = vmul.f32 %v2518_v57, %v2856_v44  ;;  %v749_v29 = vmul.f32 %v2518_v57, %v2666_v54 }
 0x108   :  { %v1715_v16 = vmax.f32 %v1699_v43, 0.0  ;;  %v750_v4 = vmul.f32 %v2518_v57, %v2858_v15  ;;  %v816_v48 = vrot.slane %v747_v8, 1  ;;  %v896_v21 = vmul.f32 %v2520_v58, %v2648_v6 }
 0x109   :  { %v1716_v23 = vmax.f32 %v1700_v0, 0.0  ;;  %v817_v30 = vrot.slane %v748_v50, 1  ;;  %v819_v10 = vrot.slane %v749_v29, 1  ;;  %v897_v3 = vmul.f32 %v2520_v58, %v2856_v44 }
 0x10a   :  { %v820_v7 = vrot.slane %v750_v4, 1  ;;  %v898_v59 = vmul.f32 %v2520_v58, %v2666_v54  ;;  %v899_v5 = vmul.f32 %v2520_v58, %v2858_v15  ;;  %v965_v62 = vrot.slane %v896_v21, 2 }
 0x10b   :  { %v1726_v26 = vpack.c.bf16 %v1716_v23, %v1715_v16  ;;  %v818_v31 = vsel %vm803_vm9, %v816_v48, %v817_v30  ;;  %v966_v19 = vrot.slane %v897_v3, 2  ;;  %v1043_v6 = vmul.f32 %v2530_v25, %v2666_v54 }
 0x10c   :  { %v821_v32 = vsel %vm803_vm9, %v819_v10, %v820_v7  ;;  %v872_v12 = vadd.f32 %v818_v31, %v707_v9  ;;  %v968_v17 = vrot.slane %v898_v59, 2  ;;  %v969_v44 = vrot.slane %v899_v5, 2 }
 0x10d   :  { %2153 = vmatmul.mubr.msk.bf16.vlgmr.msra.gmra.mrb[0].mxu1 %vm1784_vm11, %v1726_v26  ;;  %v873_v37 = vadd.f32 %v821_v32, %v708_v40  ;;  %v967_v13 = vsel %vm952_vm10, %v965_v62, %v966_v19  ;;  %v1044_v33 = vmul.f32 %v2530_v25, %v2726_v1  ;;  %v1085_v46 = vmul.f32 %v2533_v27, %v2666_v54 }
 0x10e   :  { %v970_v45 = vsel %vm952_vm10, %v968_v17, %v969_v44  ;;  %v1021_v49 = vadd.f32 %v967_v13, %v872_v12  ;;  %v1086_v52 = vmul.f32 %v2533_v27, %v2858_v15  ;;  %v1087_v56 = vmul.f32 %v2533_v27, %v2726_v1 }
 0x10f   :  { %v1022_v2 = vadd.f32 %v970_v45, %v873_v37  ;;  %v1088_v55 = vmul.f32 %v2533_v27, %v3013_v47  ;;  %v1153_v60 = vrot.slane %v1085_v46, 1  ;;  %v1233_v20 = vmul.f32 %v2542_v34, %v2666_v54 }
 0x110   :  { %v1059_v53 = vadd.f32 %v1043_v6, %v1021_v49  ;;  %v1154_v28 = vrot.slane %v1086_v52, 1  ;;  %v1156_v61 = vrot.slane %v1087_v56, 1  ;;  %v1234_v43 = vmul.f32 %v2542_v34, %v2858_v15  ;;  %v651_v56 = vld [vmem:[#allocation2 + $0x84] sm:$0x1] }
 0x111   :  { %v1060_v9 = vadd.f32 %v1044_v33, %v1022_v2  ;;  %v1157_v8 = vrot.slane %v1088_v55, 1  ;;  %v1235_v0 = vmul.f32 %v2542_v34, %v2726_v1  ;;  %v1236_v40 = vmul.f32 %v2542_v34, %v3013_v47  ;;  %v653_v2 = vld [vmem:[#allocation2 + $0x8c] sm:$0x1] }
 0x112   :  { %v1155_v50 = vsel %vm803_vm9, %v1153_v60, %v1154_v28  ;;  %v1301_v29 = vrot.slane %v1233_v20, 2  ;;  %v1302_v16 = vrot.slane %v1234_v43, 2  ;;  %v1379_v54 = vmul.f32 %v2544_v38, %v2726_v1 }
 0x113   :  { %v1158_v4 = vsel %vm803_vm9, %v1156_v61, %v1157_v8  ;;  %v1209_v48 = vadd.f32 %v1155_v50, %v1059_v53  ;;  %v1304_v21 = vrot.slane %v1235_v0, 2  ;;  %v1305_v15 = vrot.slane %v1236_v40, 2 }
 0x114   :  { %v1210_v23 = vadd.f32 %v1158_v4, %v1060_v9  ;;  %v1303_v30 = vsel %vm952_vm10, %v1301_v29, %v1302_v16  ;;  %v1380_v10 = vmul.f32 %v2544_v38, %v2719_v51  ;;  %v1421_v3 = vmul.f32 %v2546_v39, %v2726_v1 }
 0x115   :  { %v1306_v7 = vsel %vm952_vm10, %v1304_v21, %v1305_v15  ;;  %v1357_v59 = vadd.f32 %v1303_v30, %v1209_v48  ;;  %v1422_v5 = vmul.f32 %v2546_v39, %v3013_v47  ;;  %v1423_v62 = vmul.f32 %v2546_v39, %v2719_v51 }
 0x116   :  { %v1358_v26 = vadd.f32 %v1306_v7, %v1210_v23  ;;  %v1424_v31 = vmul.f32 %v2546_v39, %v3015_v22  ;;  %v1489_v19 = vrot.slane %v1421_v3, 1  ;;  %v1569_v6 = vmul.f32 %v2756_v11, %v2726_v1 }
 0x117   :  { %v1395_v32 = vadd.f32 %v1379_v54, %v1357_v59  ;;  %v1490_v12 = vrot.slane %v1422_v5, 1  ;;  %v1492_v17 = vrot.slane %v1423_v62, 1  ;;  %v1570_v44 = vmul.f32 %v2756_v11, %v3013_v47 }
 0x118   :  { %v1396_v37 = vadd.f32 %v1380_v10, %v1358_v26  ;;  %v1493_v13 = vrot.slane %v1424_v31, 1  ;;  %v1571_v33 = vmul.f32 %v2756_v11, %v2719_v51  ;;  %v1572_v46 = vmul.f32 %v2756_v11, %v3015_v22 }
 0x119   :  { %v1491_v45 = vsel %vm803_vm9, %v1489_v19, %v1490_v12  ;;  %v1637_v49 = vrot.slane %v1569_v6, 2  ;;  %v1638_v52 = vrot.slane %v1570_v44, 2  ;;  %v699_v55 = vmul.f32 %v2528_v24, %v2650_v42 }
 0x11a   :  { %v1494_v60 = vsel %vm803_vm9, %v1492_v17, %v1493_v13  ;;  %v1545_v20 = vadd.f32 %v1491_v45, %v1395_v32  ;;  %v1640_v53 = vrot.slane %v1571_v33, 2  ;;  %v1641_v28 = vrot.slane %v1572_v46, 2 }
 0x11b   :  { %v1546_v61 = vadd.f32 %v1494_v60, %v1396_v37  ;;  %v1639_v43 = vsel %vm952_vm10, %v1637_v49, %v1638_v52  ;;  %v700_v9 = vmul.f32 %v2528_v24, %v2668_v14  ;;  %v715_v8 = vadd.f32 %v2677_v63, %v699_v55 }
 0x11c   :  { %v1642_v0 = vsel %vm952_vm10, %v1640_v53, %v1641_v28  ;;  %v1693_v40 = vadd.f32 %v1639_v43, %v1545_v20  ;;  %v3094_v50 = vunpack.c.l.bf16 %v651_v56  ;;  %v3096_v29 = vunpack.c.l.bf16 %v653_v2 }
 0x11d   :  { %v1694_v16 = vadd.f32 %v1642_v0, %v1546_v61  ;;  %v716_v54 = vadd.f32 %v2677_v63, %v700_v9  ;;  %v763_v4 = vmul.f32 %v2518_v57, %v2650_v42  ;;  %v764_v48 = vmul.f32 %v2518_v57, %v2934_v18 }
 0x11e   :  { %v1709_v21 = vmax.f32 %v1693_v40, 0.0  ;;  %v765_v15 = vmul.f32 %v2518_v57, %v2668_v14  ;;  %v766_v23 = vmul.f32 %v2518_v57, %v2936_v41  ;;  %v912_v30 = vmul.f32 %v2520_v58, %v2650_v42 }
 0x11f   :  { %v1710_v10 = vmax.f32 %v1694_v16, 0.0  ;;  %v840_v3 = vrot.slane %v763_v4, 1  ;;  %v841_v7 = vrot.slane %v764_v48, 1  ;;  %v913_v63 = vmul.f32 %v2520_v58, %v2934_v18 }
 0x120   :  { %v843_v59 = vrot.slane %v765_v15, 1  ;;  %v844_v5 = vrot.slane %v766_v23, 1  ;;  %v914_v62 = vmul.f32 %v2520_v58, %v2668_v14  ;;  %v915_v26 = vmul.f32 %v2520_v58, %v2936_v41 }
 0x121   :  { %v1723_v31 = vpack.c.bf16 %v1710_v10, %v1709_v21  ;;  %v842_v19 = vsel %vm803_vm9, %v840_v3, %v841_v7  ;;  %v989_v6 = vrot.slane %v912_v30, 2  ;;  %v990_v32 = vrot.slane %v913_v63, 2 }
 0x122   :  { %v845_v42 = vsel %vm803_vm9, %v843_v59, %v844_v5  ;;  %v880_v12 = vadd.f32 %v842_v19, %v715_v8  ;;  %v992_v17 = vrot.slane %v914_v62, 2  ;;  %v993_v44 = vrot.slane %v915_v26, 2 }
 0x123   :  { %2148 = vmatprep.mubr.msk.bf16.mxu0 %vm1784_vm11, %v1723_v31  ;;  %v881_v18 = vadd.f32 %v845_v42, %v716_v54  ;;  %v991_v37 = vsel %vm952_vm10, %v989_v6, %v990_v32  ;;  %v1051_v13 = vmul.f32 %v2530_v25, %v2668_v14  ;;  %v1052_v33 = vmul.f32 %v2530_v25, %v2691_v35 }
 0x124   :  { %v994_v46 = vsel %vm952_vm10, %v992_v17, %v993_v44  ;;  %v1029_v45 = vadd.f32 %v991_v37, %v880_v12  ;;  %v1101_v49 = vmul.f32 %v2533_v27, %v2668_v14  ;;  %v1102_v52 = vmul.f32 %v2533_v27, %v2936_v41 }
 0x125   :  { %v1030_v56 = vadd.f32 %v994_v46, %v881_v18  ;;  %v1103_v2 = vmul.f32 %v2533_v27, %v2691_v35  ;;  %v1104_v55 = vmul.f32 %v2533_v27, %v3094_v50  ;;  %v1249_v60 = vmul.f32 %v2542_v34, %v2668_v14 }
 0x126   :  { %v1067_v20 = vadd.f32 %v1051_v13, %v1029_v45  ;;  %v1177_v53 = vrot.slane %v1101_v49, 1  ;;  %v1178_v28 = vrot.slane %v1102_v52, 1  ;;  %v1250_v61 = vmul.f32 %v2542_v34, %v2936_v41 }
 0x127   :  { %v1068_v43 = vadd.f32 %v1052_v33, %v1030_v56  ;;  %v1180_v9 = vrot.slane %v1103_v2, 1  ;;  %v1181_v8 = vrot.slane %v1104_v55, 1  ;;  %v1251_v0 = vmul.f32 %v2542_v34, %v2691_v35 }
 0x128   :  { %v1179_v40 = vsel %vm803_vm9, %v1177_v53, %v1178_v28  ;;  %v1252_v16 = vmul.f32 %v2542_v34, %v3094_v50  ;;  %v1325_v54 = vrot.slane %v1249_v60, 2  ;;  %v1326_v4 = vrot.slane %v1250_v61, 2 }
 0x129   :  { %v1182_v14 = vsel %vm803_vm9, %v1180_v9, %v1181_v8  ;;  %v1217_v48 = vadd.f32 %v1179_v40, %v1067_v20  ;;  %v1328_v21 = vrot.slane %v1251_v0, 2  ;;  %v1387_v41 = vmul.f32 %v2544_v38, %v2691_v35  ;;  %v3179_v9 = vld [vmem:[%s3329_s2] ss:$0 sm:$0xff] }
 0x12a   :  { %v1218_v15 = vadd.f32 %v1182_v14, %v1068_v43  ;;  %v1327_v23 = vsel %vm952_vm10, %v1325_v54, %v1326_v4  ;;  %v1329_v30 = vrot.slane %v1252_v16, 2  ;;  %v1388_v10 = vmul.f32 %v2544_v38, %v2693_v36 }
 0x12b   :  { %v1365_v3 = vadd.f32 %v1327_v23, %v1217_v48  ;;  %v1437_v7 = vmul.f32 %v2546_v39, %v2691_v35  ;;  %v1438_v63 = vmul.f32 %v2546_v39, %v3094_v50  ;;  %v1439_v59 = vmul.f32 %v2546_v39, %v2693_v36 }
 0x12c   :  { %v1330_v5 = vsel %vm952_vm10, %v1328_v21, %v1329_v30  ;;  %v1440_v62 = vmul.f32 %v2546_v39, %v3096_v29  ;;  %v1585_v26 = vmul.f32 %v2756_v11, %v2691_v35  ;;  %v1586_v31 = vmul.f32 %v2756_v11, %v3094_v50  ;;  %v634_v21 = vld [vmem:[#allocation2 + $0x40] ss:$8 sps:$4 sm:$0xff]   ;;  %v635_v30 = vld [vmem:[#allocation2 + $0x44] sm:$0x1] }
 0x12d   :  { %v1366_v19 = vadd.f32 %v1330_v5, %v1218_v15  ;;  %v1403_v6 = vadd.f32 %v1387_v41, %v1365_v3  ;;  %v1513_v32 = vrot.slane %v1437_v7, 1  ;;  %v1514_v42 = vrot.slane %v1438_v63, 1 }
 0x12e   :  { %v1516_v12 = vrot.slane %v1439_v59, 1  ;;  %v1517_v17 = vrot.slane %v1440_v62, 1  ;;  %v1587_v44 = vmul.f32 %v2756_v11, %v2693_v36  ;;  %v1588_v18 = vmul.f32 %v2756_v11, %v3096_v29 }
 0x12f   :  { %v1404_v37 = vadd.f32 %v1388_v10, %v1366_v19  ;;  %v1515_v13 = vsel %vm803_vm9, %v1513_v32, %v1514_v42  ;;  %v1661_v33 = vrot.slane %v1585_v26, 2  ;;  %v1662_v46 = vrot.slane %v1586_v31, 2 }
 0x130   :  { %v1518_v45 = vsel %vm803_vm9, %v1516_v12, %v1517_v17  ;;  %v1553_v49 = vadd.f32 %v1515_v13, %v1403_v6  ;;  %v1664_v52 = vrot.slane %v1587_v44, 2  ;;  %v1665_v56 = vrot.slane %v1588_v18, 2 }
 0x131   :  { %v1554_v2 = vadd.f32 %v1518_v45, %v1404_v37  ;;  %v1663_v55 = vsel %vm952_vm10, %v1661_v33, %v1662_v46  ;;  %v693_v60 = vmul.f32 %v2528_v24, %v2726_v1  ;;  %v694_v20 = vmul.f32 %v2528_v24, %v2719_v51 }
 0x132   :  { %v1666_v11 = vsel %vm952_vm10, %v1664_v52, %v1665_v56  ;;  %v1701_v53 = vadd.f32 %v1663_v55, %v1553_v49  ;;  %v751_v28 = vmul.f32 %v2518_v57, %v2726_v1  ;;  %v752_v61 = vmul.f32 %v2518_v57, %v3013_v47 }
 0x133   :  { %v1702_v43 = vadd.f32 %v1666_v11, %v1554_v2  ;;  %v709_v8 = vadd.f32 %v3179_v9, %v693_v60  ;;  %v710_v0 = vadd.f32 %v3179_v9, %v694_v20  ;;  %v753_v40 = vmul.f32 %v2518_v57, %v2719_v51 }
 0x134   :  { %v1717_v16 = vmax.f32 %v1701_v53, 0.0  ;;  %v754_v54 = vmul.f32 %v2518_v57, %v3015_v22  ;;  %v822_v4 = vrot.slane %v751_v28, 1  ;;  %v823_v14 = vrot.slane %v752_v61, 1  ;;  %v637_v53 = vld [vmem:[#allocation2 + $0x4c] sm:$0x1] }
 0x135   :  { %v1718_v48 = vmax.f32 %v1702_v43, 0.0  ;;  %v825_v41 = vrot.slane %v753_v40, 1  ;;  %v900_v15 = vmul.f32 %v2520_v58, %v2726_v1  ;;  %v901_v23 = vmul.f32 %v2520_v58, %v3013_v47 }
 0x136   :  { %v824_v10 = vsel %vm803_vm9, %v822_v4, %v823_v14  ;;  %v826_v3 = vrot.slane %v754_v54, 1  ;;  %v902_v7 = vmul.f32 %v2520_v58, %v2719_v51  ;;  %v903_v63 = vmul.f32 %v2520_v58, %v3015_v22 }
 0x137   :  { %v1727_v59 = vpack.c.bf16 %v1718_v48, %v1717_v16  ;;  %v874_v5 = vadd.f32 %v824_v10, %v709_v8  ;;  %v971_v62 = vrot.slane %v900_v15, 2  ;;  %v972_v26 = vrot.slane %v901_v23, 2 }
 0x138   :  { %v827_v31 = vsel %vm803_vm9, %v825_v41, %v826_v3  ;;  %v974_v1 = vrot.slane %v902_v7, 2  ;;  %v975_v19 = vrot.slane %v903_v63, 2  ;;  %v1033_v6 = vunpack.c.l.bf16 %v634_v21 }
 0x139   :  { %2156 = vmatprep.mubr.msk.bf16.mxu1 %vm1784_vm11, %v1727_v59  ;;  %v875_v47 = vadd.f32 %v827_v31, %v710_v0  ;;  %v973_v32 = vsel %vm952_vm10, %v971_v62, %v972_v26  ;;  %v1045_v42 = vmul.f32 %v2530_v25, %v2719_v51  ;;  %v1071_v12 = vunpack.c.l.bf16 %v635_v30 }
 0x13a   :  { %v976_v17 = vsel %vm952_vm10, %v974_v1, %v975_v19  ;;  %v1023_v44 = vadd.f32 %v973_v32, %v874_v5  ;;  %v1046_v18 = vmul.f32 %v2530_v25, %v1033_v6  ;;  %v1089_v37 = vmul.f32 %v2533_v27, %v2719_v51 }
 0x13b   :  { %v1024_v13 = vadd.f32 %v976_v17, %v875_v47  ;;  %v1090_v33 = vmul.f32 %v2533_v27, %v3015_v22  ;;  %v1091_v46 = vmul.f32 %v2533_v27, %v1033_v6  ;;  %v1092_v45 = vmul.f32 %v2533_v27, %v1071_v12 }
 0x13c   :  { %v1061_v49 = vadd.f32 %v1045_v42, %v1023_v44  ;;  %v1159_v52 = vrot.slane %v1089_v37, 1  ;;  %v1237_v56 = vmul.f32 %v2542_v34, %v2719_v51  ;;  %v1238_v2 = vmul.f32 %v2542_v34, %v3015_v22 }
 0x13d   :  { %v1062_v55 = vadd.f32 %v1046_v18, %v1024_v13  ;;  %v1160_v60 = vrot.slane %v1090_v33, 1  ;;  %v1162_v20 = vrot.slane %v1091_v46, 1  ;;  %v1163_v11 = vrot.slane %v1092_v45, 1 }
 0x13e   :  { %v1239_v28 = vmul.f32 %v2542_v34, %v1033_v6  ;;  %v1240_v61 = vmul.f32 %v2542_v34, %v1071_v12  ;;  %v1307_v43 = vrot.slane %v1237_v56, 2  ;;  %v1308_v8 = vrot.slane %v1238_v2, 2 }
 0x13f   :  { %v1161_v0 = vsel %vm803_vm9, %v1159_v52, %v1160_v60  ;;  %v1164_v40 = vsel %vm803_vm9, %v1162_v20, %v1163_v11  ;;  %v1369_v16 = vunpack.c.h.bf16 %v634_v21  ;;  %v1381_v51 = vmul.f32 %v2544_v38, %v1033_v6  ;;  %v3226_v21 = vld [vmem:[%s3328_s1 + $0x8] ss:$0 sm:$0xff] }
 0x140   :  { %v1211_v54 = vadd.f32 %v1161_v0, %v1061_v49  ;;  %v1212_v22 = vadd.f32 %v1164_v40, %v1062_v55  ;;  %v1309_v4 = vsel %vm952_vm10, %v1307_v43, %v1308_v8  ;;  %v1310_v14 = vrot.slane %v1239_v28, 2 }
 0x141   :  { %v1311_v48 = vrot.slane %v1240_v61, 2  ;;  %v1382_v41 = vmul.f32 %v2544_v38, %v1369_v16  ;;  %v1407_v15 = vunpack.c.l.bf16 %v637_v53  ;;  %v1425_v23 = vmul.f32 %v2546_v39, %v1033_v6 }
 0x142   :  { %v1359_v30 = vadd.f32 %v1309_v4, %v1211_v54  ;;  %v1426_v10 = vmul.f32 %v2546_v39, %v1071_v12  ;;  %v1427_v3 = vmul.f32 %v2546_v39, %v1369_v16  ;;  %v1573_v7 = vmul.f32 %v3226_v21, %v1033_v6 }
 0x143   :  { %v1312_v63 = vsel %vm952_vm10, %v1310_v14, %v1311_v48  ;;  %v1428_v59 = vmul.f32 %v2546_v39, %v1407_v15  ;;  %v1495_v5 = vrot.slane %v1425_v23, 1  ;;  %v1574_v62 = vmul.f32 %v3226_v21, %v1071_v12 }
 0x144   :  { %v1360_v26 = vadd.f32 %v1312_v63, %v1212_v22  ;;  %v1397_v31 = vadd.f32 %v1381_v51, %v1359_v30  ;;  %v1496_v1 = vrot.slane %v1426_v10, 1  ;;  %v1498_v19 = vrot.slane %v1427_v3, 1 }
 0x145   :  { %v1499_v47 = vrot.slane %v1428_v59, 1  ;;  %v1575_v32 = vmul.f32 %v3226_v21, %v1369_v16  ;;  %v1576_v42 = vmul.f32 %v3226_v21, %v1407_v15  ;;  %v1643_v17 = vrot.slane %v1573_v7, 2  ;;  %v654_v16 = vld [vmem:[#allocation2 + $0x90] ss:$8 sps:$4 sm:$0xff]  }
 0x146   :  { %v1398_v44 = vadd.f32 %v1382_v41, %v1360_v26  ;;  %v1497_v6 = vsel %vm803_vm9, %v1495_v5, %v1496_v1  ;;  %v1644_v18 = vrot.slane %v1574_v62, 2  ;;  %v701_v37 = vmul.f32 %v2528_v24, %v2691_v35 }
 0x147   :  { %v1500_v13 = vsel %vm803_vm9, %v1498_v19, %v1499_v47  ;;  %v1547_v12 = vadd.f32 %v1497_v6, %v1397_v31  ;;  %v1646_v33 = vrot.slane %v1575_v32, 2  ;;  %v1647_v46 = vrot.slane %v1576_v42, 2 }
 0x148   :  { %v1548_v45 = vadd.f32 %v1500_v13, %v1398_v44  ;;  %v1645_v49 = vsel %vm952_vm10, %v1643_v17, %v1644_v18  ;;  %v702_v52 = vmul.f32 %v2528_v24, %v2693_v36  ;;  %v717_v56 = vadd.f32 %v3179_v9, %v701_v37 }
 0x149   :  { %v1648_v2 = vsel %vm952_vm10, %v1646_v33, %v1647_v46  ;;  %v1695_v55 = vadd.f32 %v1645_v49, %v1547_v12  ;;  %v767_v60 = vmul.f32 %v2518_v57, %v2691_v35  ;;  %v768_v20 = vmul.f32 %v2518_v57, %v3094_v50  ;;  %v657_v12 = vld [vmem:[#allocation2 + $0x9c] sm:$0x1] }
 0x14a   :  { %v1696_v11 = vadd.f32 %v1648_v2, %v1548_v45  ;;  %v718_v53 = vadd.f32 %v3179_v9, %v702_v52  ;;  %v769_v28 = vmul.f32 %v2518_v57, %v2693_v36  ;;  %v770_v24 = vmul.f32 %v2518_v57, %v3096_v29  ;;  %v655_v9 = vld [vmem:[#allocation2 + $0x94] sm:$0x1] }
 0x14b   :  { %v1711_v61 = vmax.f32 %v1695_v55, 0.0  ;;  %v846_v43 = vrot.slane %v767_v60, 1  ;;  %v847_v8 = vrot.slane %v768_v20, 1  ;;  %v916_v0 = vmul.f32 %v2520_v58, %v2691_v35 }
 0x14c   :  { %v1712_v40 = vmax.f32 %v1696_v11, 0.0  ;;  %v849_v51 = vrot.slane %v769_v28, 1  ;;  %v850_v54 = vrot.slane %v770_v24, 1  ;;  %v917_v22 = vmul.f32 %v2520_v58, %v3094_v50 }
 0x14d   :  { %v848_v4 = vsel %vm803_vm9, %v846_v43, %v847_v8  ;;  %v918_v14 = vmul.f32 %v2520_v58, %v2693_v36  ;;  %v919_v57 = vmul.f32 %v2520_v58, %v3096_v29  ;;  %v995_v48 = vrot.slane %v916_v0, 2 }
 0x14e   :  { %v1724_v41 = vpack.c.bf16 %v1712_v40, %v1711_v61  ;;  %v851_v35 = vsel %vm803_vm9, %v849_v51, %v850_v54  ;;  %v882_v15 = vadd.f32 %v848_v4, %v717_v56  ;;  %v996_v23 = vrot.slane %v917_v22, 2 }
 0x14f   :  { %v883_v30 = vadd.f32 %v851_v35, %v718_v53  ;;  %v998_v10 = vrot.slane %v918_v14, 2  ;;  %v999_v3 = vrot.slane %v919_v57, 2  ;;  %v1034_v7 = vunpack.c.l.bf16 %v654_v16 }
 0x150   :  { %2149 = vmatmul.mubr.msk.bf16.gmra.mrb[4].mxu0 %vm1784_vm11, %v1724_v41  ;;  %v997_v50 = vsel %vm952_vm10, %v995_v48, %v996_v23  ;;  %v1053_v63 = vmul.f32 %v2530_v25, %v2693_v36  ;;  %v1072_v59 = vunpack.c.l.bf16 %v655_v9  ;;  %v1105_v58 = vmul.f32 %v2533_v27, %v2693_v36 }
 0x151   :  { %v1000_v5 = vsel %vm952_vm10, %v998_v10, %v999_v3  ;;  %v1031_v62 = vadd.f32 %v997_v50, %v882_v15  ;;  %v1054_v26 = vmul.f32 %v2530_v25, %v1034_v7  ;;  %v1106_v31 = vmul.f32 %v2533_v27, %v3096_v29 }
 0x152   :  { %v1032_v1 = vadd.f32 %v1000_v5, %v883_v30  ;;  %v1107_v19 = vmul.f32 %v2533_v27, %v1034_v7  ;;  %v1108_v47 = vmul.f32 %v2533_v27, %v1072_v59  ;;  %v1183_v32 = vrot.slane %v1105_v58, 1  ;;  %v2008_v5 = vld [vmem:[%s3330_s4] ss:$0 sm:$0xff] }
 0x153   :  { %v1069_v42 = vadd.f32 %v1053_v63, %v1031_v62  ;;  %v1184_v17 = vrot.slane %v1106_v31, 1  ;;  %v1253_v44 = vmul.f32 %v2542_v34, %v2693_v36  ;;  %v1254_v6 = vmul.f32 %v2542_v34, %v3096_v29 }
 0x154   :  { %v1070_v18 = vadd.f32 %v1054_v26, %v1032_v1  ;;  %v1186_v37 = vrot.slane %v1107_v19, 1  ;;  %v1187_v25 = vrot.slane %v1108_v47, 1  ;;  %v1255_v13 = vmul.f32 %v2542_v34, %v1034_v7 }
 0x155   :  { %v1185_v33 = vsel %vm803_vm9, %v1183_v32, %v1184_v17  ;;  %v1256_v46 = vmul.f32 %v2542_v34, %v1072_v59  ;;  %v1331_v27 = vrot.slane %v1253_v44, 2  ;;  %v1332_v45 = vrot.slane %v1254_v6, 2 }
 0x156   :  { %v1188_v49 = vsel %vm803_vm9, %v1186_v37, %v1187_v25  ;;  %v1219_v52 = vadd.f32 %v1185_v33, %v1069_v42  ;;  %v1334_v56 = vrot.slane %v1255_v13, 2  ;;  %v1370_v36 = vunpack.c.h.bf16 %v654_v16 }
 0x157   :  { %v1220_v2 = vadd.f32 %v1188_v49, %v1070_v18  ;;  %v1333_v29 = vsel %vm952_vm10, %v1331_v27, %v1332_v45  ;;  %v1335_v55 = vrot.slane %v1256_v46, 2  ;;  %v1389_v60 = vmul.f32 %v2544_v38, %v1034_v7 }
 0x158   :  { %v1367_v20 = vadd.f32 %v1333_v29, %v1219_v52  ;;  %v1390_v11 = vmul.f32 %v2544_v38, %v1370_v36  ;;  %v1408_v53 = vunpack.c.l.bf16 %v657_v12  ;;  %v1441_v28 = vmul.f32 %v2546_v39, %v1034_v7 }
 0x159   :  { %v1336_v34 = vsel %vm952_vm10, %v1334_v56, %v1335_v55  ;;  %v1442_v24 = vmul.f32 %v2546_v39, %v1072_v59  ;;  %v1443_v61 = vmul.f32 %v2546_v39, %v1370_v36  ;;  %v1589_v43 = vmul.f32 %v3226_v21, %v1034_v7 }
 0x15a   :  { %v1368_v8 = vadd.f32 %v1336_v34, %v1220_v2  ;;  %v1405_v0 = vadd.f32 %v1389_v60, %v1367_v20  ;;  %v1444_v40 = vmul.f32 %v2546_v39, %v1408_v53  ;;  %v1519_v16 = vrot.slane %v1441_v28, 1 }
 0x15b   :  { %v1520_v51 = vrot.slane %v1442_v24, 1  ;;  %v1522_v54 = vrot.slane %v1443_v61, 1  ;;  %v1590_v38 = vmul.f32 %v3226_v21, %v1072_v59  ;;  %v1591_v22 = vmul.f32 %v3226_v21, %v1370_v36 }
 0x15c   :  { %v1406_v9 = vadd.f32 %v1390_v11, %v1368_v8  ;;  %v1523_v4 = vrot.slane %v1444_v40, 1  ;;  %v1592_v14 = vmul.f32 %v3226_v21, %v1408_v53  ;;  %v1667_v57 = vrot.slane %v1589_v43, 2 }
 0x15d   :  { %v1521_v48 = vsel %vm803_vm9, %v1519_v16, %v1520_v51  ;;  %v1668_v41 = vrot.slane %v1590_v38, 2  ;;  %v1670_v35 = vrot.slane %v1591_v22, 2 }
 0x15e   :  { %v1524_v15 = vsel %vm803_vm9, %v1522_v54, %v1523_v4  ;;  %v1555_v23 = vadd.f32 %v1521_v48, %v1405_v0  ;;  %v1671_v39 = vrot.slane %v1592_v14, 2 }
 0x15f   :  { %v1556_v30 = vadd.f32 %v1524_v15, %v1406_v9  ;;  %v1669_v10 = vsel %vm952_vm10, %v1667_v57, %v1668_v41 }
 0x160   :  { %v1672_v3 = vsel %vm952_vm10, %v1670_v35, %v1671_v39  ;;  %v1703_v7 = vadd.f32 %v1669_v10, %v1555_v23 }
 0x161   :  { %v1704_v50 = vadd.f32 %v1672_v3, %v1556_v30 }
 0x162   :  { %v1719_v63 = vmax.f32 %v1703_v7, 0.0 }
 0x163   :  { %v1720_v59 = vmax.f32 %v1704_v50, 0.0 }
 0x165   :  { %v1728_v58 = vpack.c.bf16 %v1720_v59, %v1719_v63 }
 0x167   :  { %2157 = vmatmul.mubr.msk.bf16.gmra.mrb[4].mxu1 %vm1784_vm11, %v1728_v58 }
 0x1ca   :  { %v2146_v21 = vpop.f32.mrb[0].mxu0 }
 0x1cb   :  { %v1843_v62 = vpop.f32.mrb[1].mxu0  ;;  %v1852_v31 = vadd.f32 %v2146_v21, %v2008_v5 }
 0x1cc   :  { %v2147_v26 = vpop.f32.mrb[2].mxu0  ;;  %v1844_v47 = vadd.f32 %v2008_v5, %v1843_v62 }
 0x1cd   :  { %v1855_v1 = vadd.f32 %v2147_v26, %v2008_v5  ;;  %v1846_v19 = vpop.f32.mrb[3].mxu0 }
 0x1ce   :  { %v1847_v32 = vadd.f32 %v2008_v5, %v1846_v19 }
 0x1cf   :  { %v2079_v42 = vpack.c.bf16 %v1855_v1, %v1852_v31 }
 0x1d0   :  { %v2074_v17 = vpack.c.bf16 %v1847_v32, %v1844_v47 }
 0x1d1   :  { %2111 = vst [vmem:[%s3331_s5 + $0x8] sm:$0xff] %v2079_v42  }
 0x1d2   :  { %2075 = vst [vmem:[%s3331_s5] sm:$0xff] %v2074_v17  }
 0x1e0   :  { %v2154_v44 = vpop.f32.mrb[0].mxu1 }
 0x1e1   :  { %v1875_v6 = vpop.f32.mrb[1].mxu1  ;;  %v1884_v37 = vadd.f32 %v2154_v44, %v2008_v5 }
 0x1e2   :  { %v2155_v18 = vpop.f32.mrb[2].mxu1  ;;  %v1876_v12 = vadd.f32 %v2008_v5, %v1875_v6 }
 0x1e3   :  { %v1887_v25 = vadd.f32 %v2155_v18, %v2008_v5  ;;  %v1878_v13 = vpop.f32.mrb[3].mxu1 }
 0x1e4   :  { %v1879_v33 = vadd.f32 %v2008_v5, %v1878_v13 }
 0x1e5   :  { %v2099_v46 = vpack.c.bf16 %v1887_v25, %v1884_v37 }
 0x1e6   :  { %v2094_v27 = vpack.c.bf16 %v1879_v33, %v1876_v12 }
 0x1e7   :  { %2115 = vst [vmem:[%s3331_s5 + $0x28] sm:$0xff] %v2099_v46  }
 0x1e8   :  { %2114 = vst [vmem:[%s3331_s5 + $0x20] sm:$0xff] %v2094_v27  }
 0x223   :  { %v2150_v45 = vpop.f32.mrb[4].mxu0 }
 0x224   :  { %v1859_v49 = vpop.f32.mrb[5].mxu0  ;;  %v1868_v56 = vadd.f32 %v2150_v45, %v2008_v5 }
 0x225   :  { %v2151_v52 = vpop.f32.mrb[6].mxu0  ;;  %v1860_v29 = vadd.f32 %v2008_v5, %v1859_v49 }
 0x226   :  { %v1871_v36 = vadd.f32 %v2151_v52, %v2008_v5  ;;  %v1862_v2 = vpop.f32.mrb[7].mxu0 }
 0x227   :  { %v1863_v55 = vadd.f32 %v2008_v5, %v1862_v2 }
 0x228   :  { %v2089_v60 = vpack.c.bf16 %v1871_v36, %v1868_v56 }
 0x229   :  { %v2084_v20 = vpack.c.bf16 %v1863_v55, %v1860_v29 }
 0x22a   :  { %2113 = vst [vmem:[%s3331_s5 + $0x18] sm:$0xff] %v2089_v60  }
 0x22b   :  { %2112 = vst [vmem:[%s3331_s5 + $0x10] sm:$0xff] %v2084_v20  }
 0x23a   :  { %v2158_v11 = vpop.f32.mrb[4].mxu1 }
 0x23b   :  { %v1891_v53 = vpop.f32.mrb[5].mxu1  ;;  %v1900_v34 = vadd.f32 %v2158_v11, %v2008_v5 }
 0x23c   :  { %v2159_v28 = vpop.f32.mrb[6].mxu1  ;;  %v1892_v43 = vadd.f32 %v2008_v5, %v1891_v53 }
 0x23d   :  { %v1903_v24 = vadd.f32 %v2159_v28, %v2008_v5  ;;  %v1894_v61 = vpop.f32.mrb[7].mxu1 }
 0x23e   :  { %v1895_v8 = vadd.f32 %v2008_v5, %v1894_v61 }
 0x23f   :  { %v2109_v0 = vpack.c.bf16 %v1903_v24, %v1900_v34 }
 0x240   :  { %v2104_v40 = vpack.c.bf16 %v1895_v8, %v1892_v43 }
 0x241   :  { %2117 = vst [vmem:[%s3331_s5 + $0x38] sm:$0xff] %v2109_v0  }
 0x242   :  { %2116 = vst [vmem:[%s3331_s5 + $0x30] sm:$0xff] %v2104_v40  }

</bundles_post_ra>
